<compile_context>
chip_gen: v6e
topology: v6e:2x2x1
jax: 0.10.0
libtpu: 0.0.40
codegen_flags: <defaults>
</compile_context>

<pallas_src>
import functools

import jax
import jax.numpy as jnp
from jax.experimental import pallas as pl
from jax.experimental.pallas import tpu as pltpu

VMEM = pl.BlockSpec(memory_space=pltpu.MemorySpace.VMEM)
SEG = 128  # lane-aligned stride for fused gate / projection segments


# --------------------------------------------------------------------------
# Packed-parameter layout (two blobs: "wide" = 512 lanes, "narrow" = 128 lanes)
# --------------------------------------------------------------------------
def make_layout(nfeat, nhid, nclass, gru_in):
    c = nclass
    h2 = 2 * nclass
    entries = [
        # (name, blob, rows, cols) -- weights first (8-row-aligned starts), biases last
        ("rnn_w",   "wide",   gru_in, 3 * SEG),   # GRU gates [r | z | n], fwd+bwd lanes
        ("c2_w",    "wide",   nhid,   4 * SEG),   # conv2 [q | k | v | skip]
        ("s2s_wh",  "wide",   c,      4 * SEG),   # Set2Set LSTM gates [i | f | g | o]
        ("s2s_wr",  "wide",   c,      4 * SEG),
        ("rnn_b",   "wide",   1,      3 * SEG),
        ("c2_b",    "wide",   1,      4 * SEG),
        ("s2s_b",   "wide",   1,      4 * SEG),
        ("c1_w",    "narrow", nfeat,  4 * nhid),  # conv1 [q|k|v|skip] == 128 lanes
        ("fc1_w",   "narrow", nfeat,  c),
        ("fc2_w",   "narrow", 8 * c,  c),
        ("fc3_w",   "narrow", c,      64),
        ("fc4_w",   "narrow", 64,     32),
        ("fc5_w",   "narrow", 32,     1),
        ("c1_b",    "narrow", 1,      4 * nhid),
        ("fc1_b",   "narrow", 1,      c),
        ("fc2_b",   "narrow", 1,      c),
        ("fc3_b",   "narrow", 1,      64),
        ("fc4_b",   "narrow", 1,      32),
        ("fc5_b",   "narrow", 1,      1),
        ("rnn_bhn", "narrow", 1,      h2),
    ]
    layout = {}
    nrows = {"wide": 0, "narrow": 0}
    width = {"wide": 0, "narrow": 0}
    for name, blob, nr, nc in entries:
        layout[name] = (blob, nrows[blob], nr, nc)
        nrows[blob] += nr if nr == 1 else -(-nr // 8) * 8  # sublane-align matrix starts
        width[blob] = max(width[blob], nc)
    shapes = {b: (nrows[b], width[b]) for b in ("wide", "narrow")}
    return layout, shapes


def init_params(key, nfeat, nhid, nclass, gru_in=100, vocab=100):
    """Deterministic synthetic params, generated directly in the fused packed layout."""
    c = nclass
    h2 = 2 * nclass
    keys = iter(jax.random.split(key, 64))

    def mat(shape, scale=0.1):
        return jax.random.normal(next(keys), shape, jnp.float32) * scale

    def seg_pack(pieces):
        # place each piece at a 128-lane-aligned offset (lane-aligned gate segments)
        rows = pieces[0].shape[0]
        out = jnp.zeros((rows, SEG * len(pieces)), jnp.float32)
        for i, p in enumerate(pieces):
            out = out.at[:, i * SEG:i * SEG + p.shape[1]].set(p)
        return out

    logical = {
        # GRU (bidirectional, 1 step, h0=0): each segment holds [fwd | bwd] = 2H lanes.
        # rnn_b = b_i + b_h for r/z and b_in for n;  rnn_bhn = hidden bias of n gate.
        "rnn_w":   seg_pack([mat((gru_in, h2)) for _ in range(3)]),
        "rnn_b":   seg_pack([mat((1, h2)) for _ in range(3)]),
        "rnn_bhn": mat((1, h2)),
        # TransformerConv fused projections [q | k | v | skip]
        "c1_w": mat((nfeat, 4 * nhid)), "c1_b": mat((1, 4 * nhid)),
        "c2_w": seg_pack([mat((nhid, c)) for _ in range(4)]),
        "c2_b": seg_pack([mat((1, c)) for _ in range(4)]),
        "fc1_w": mat((nfeat, c)), "fc1_b": mat((1, c)),
        # Set2Set LSTM: Wh acts on previous LSTM output q (== W_ih[:, :C] + W_hh),
        # Wr acts on previous readout r (== W_ih[:, C:2C]); exact reparameterisation.
        "s2s_wh": seg_pack([mat((c, c)) for _ in range(4)]),
        "s2s_wr": seg_pack([mat((c, c)) for _ in range(4)]),
        "s2s_b":  seg_pack([mat((1, c)) for _ in range(4)]),
        "fc2_w": mat((8 * c, c)), "fc2_b": mat((1, c)),
        "fc3_w": mat((c, 64)), "fc3_b": mat((1, 64)),
        "fc4_w": mat((64, 32)), "fc4_b": mat((1, 32)),
        "fc5_w": mat((32, 1)), "fc5_b": mat((1, 1)),
    }
    layout, shapes = make_layout(nfeat, nhid, nclass, gru_in)
    blobs = {b: jnp.zeros(shapes[b], jnp.float32) for b in shapes}
    for name, (blob, r0, nr, nc) in layout.items():
        blobs[blob] = blobs[blob].at[r0:r0 + nr, 0:nc].set(logical[name])
    return {"embed": mat((vocab, gru_in)),
            "wide": blobs["wide"], "narrow": blobs["narrow"]}


# --------------------------------------------------------------------------
# The single fused forward kernel
# --------------------------------------------------------------------------
def _fused_forward_kernel(dims, layout,
                          x_ref, adj_ref, g_ref, gt_ref, sm_ref,
                          wide_ref, narrow_ref, out_ref):
    B = dims["batch"]
    C = dims["nclass"]
    nhid = dims["nhid"]
    L = dims["smlen"]
    h2 = 2 * C
    f32 = jnp.float32

    def getp(name):
        blob, r0, nr, nc = layout[name]
        ref = wide_ref if blob == "wide" else narrow_ref
        return ref[r0:r0 + nr, 0:nc]          # static slice of a VMEM ref

    x = x_ref[...]                  # (Ntot, nfeat)   solute nodes then solvent nodes
    adj_mask = adj_ref[...] > 0.0   # (Ntot, Ntot)    block-diag over graphs & branches
    g = g_ref[...]                  # (Ntot, 2B)      node -> graph one-hot (f32)
    gt = gt_ref[...]                # (2B, Ntot)
    sm = sm_ref[...]                # (2L, 100)       solute smiles rows then solvent

    # ---------- fc1 residual init + conv1 + conv2 (both branches in one pass) --------
    init = jnp.dot(x, getp("fc1_w"), preferred_element_type=f32) + getp("fc1_b")

    def tconv(h, w_cat, b_cat, d, seg):
        proj = jnp.dot(h, w_cat, preferred_element_type=f32) + b_cat
        q = proj[:, 0:d]
        k = proj[:, seg:seg + d]
        v = proj[:, 2 * seg:2 * seg + d]
        skip = proj[:, 3 * seg:3 * seg + d]
        # q @ k^T without materialising k.T (trans_b form feeds the MXU directly)
        scores = jax.lax.dot_general(q, k, (((1,), (1,)), ((), ())),
                                     preferred_element_type=f32) * (1.0 / d ** 0.5)
        m = jnp.max(jnp.where(adj_mask, scores, -1e30), axis=-1, keepdims=True)
        p = jnp.exp(jnp.minimum(scores - m, 0.0))       # clamp: no inf on masked lanes
        p = jnp.where(adj_mask, p, 0.0)
        s = jnp.sum(p, axis=-1, keepdims=True)
        attn = p * pl.reciprocal(jnp.where(s > 0.0, s, 1.0), approx=True)
        return jnp.dot(attn, v, preferred_element_type=f32) + skip

    h1 = jnp.maximum(tconv(x, getp("c1_w"), getp("c1_b"), nhid, nhid), 0.0)
    feat = tconv(h1, getp("c2_w"), getp("c2_b"), C, SEG) + init       # (Ntot, C)

    # ---------- Set2Set over all 2B graphs at once (batched LSTM + segment softmax) ---
    s2s_wh = getp("s2s_wh")
    s2s_wr = getp("s2s_wr")
    s2s_b = getp("s2s_b")
    q = jnp.zeros((2 * B, C), f32)        # previous LSTM output (== hidden)
    r = jnp.zeros((2 * B, C), f32)        # previous readout
    cell = jnp.zeros((2 * B, C), f32)
    for _ in range(2):                    # processing_steps = 2 (static unroll)
        gates = (jnp.dot(q, s2s_wh, preferred_element_type=f32)
                 + jnp.dot(r, s2s_wr, preferred_element_type=f32) + s2s_b)  # (2B, 4*SEG)
        i_g = jax.nn.sigmoid(gates[:, 0:C])
        f_g = jax.nn.sigmoid(gates[:, SEG:SEG + C])
        g_g = jnp.tanh(gates[:, 2 * SEG:2 * SEG + C])
        o_g = jax.nn.sigmoid(gates[:, 3 * SEG:3 * SEG + C])
        cell = f_g * cell + i_g * g_g
        q = o_g * jnp.tanh(cell)                                      # (2B, C)
        # per-graph attention pooling via membership matmuls / masked reductions
        q_pn = jnp.dot(g, q, preferred_element_type=f32)              # (Ntot, C)
        e = jnp.sum(feat * q_pn, axis=-1, keepdims=True)              # (Ntot, 1)
        e_gr = jnp.where(g > 0.5, e, -1e30)                           # (Ntot, 2B)
        m_g = jnp.max(e_gr, axis=0, keepdims=True)                    # (1, 2B)
        m_pn = jnp.sum(g * m_g, axis=-1, keepdims=True)               # per-node max
        a = jnp.exp(e - m_pn)                                         # (Ntot, 1)
        s_g = jnp.sum(g * a, axis=0, keepdims=True)                   # (1, 2B)
        s_pn = jnp.sum(g * s_g, axis=-1, keepdims=True)               # (Ntot, 1)
        a = a * pl.reciprocal(s_pn, approx=True)
        r = jnp.dot(gt, a * feat, preferred_element_type=f32)         # (2B, C)

    # ---------- bidirectional GRU (seq_len == 1, h0 = 0), relu, mean over tokens -----
    pre = jnp.dot(sm, getp("rnn_w"), preferred_element_type=f32) + getp("rnn_b")
    r_gate = jax.nn.sigmoid(pre[:, 0:h2])
    z_gate = jax.nn.sigmoid(pre[:, SEG:SEG + h2])
    n_gate = jnp.tanh(pre[:, 2 * SEG:2 * SEG + h2] + r_gate * getp("rnn_bhn"))
    hr = jnp.maximum((1.0 - z_gate) * n_gate, 0.0)                    # (2L, 2H)
    after_su = jnp.broadcast_to(jnp.mean(hr[0:L], axis=0, keepdims=True), (B, h2))
    after_sv = jnp.broadcast_to(jnp.mean(hr[L:2 * L], axis=0, keepdims=True), (B, h2))

    # ---------- concat + MLP tail (dropout == identity at eval) ----------------------
    data = jnp.concatenate(
        [q[0:B], r[0:B], after_su, q[B:2 * B], r[B:2 * B], after_sv], axis=-1)  # (B, 8C)
    d = jnp.maximum(
        jnp.dot(data, getp("fc2_w"), preferred_element_type=f32) + getp("fc2_b"), 0.0)
    d = jnp.maximum(
        jnp.dot(d, getp("fc3_w"), preferred_element_type=f32) + getp("fc3_b"), 0.0)
    d = jnp.maximum(
        jnp.dot(d, getp("fc4_w"), preferred_element_type=f32) + getp("fc4_b"), 0.0)
    out_ref[...] = (
        jnp.dot(d, getp("fc5_w"), preferred_element_type=f32) + getp("fc5_b"))


# --------------------------------------------------------------------------
# Forward pass (mirrors MyValModel.forward) — exactly ONE pallas_call
# --------------------------------------------------------------------------
def forward(params, solute_adj, solute_meth, solvent_meth, solvent_adj_meth, smiles,
            *, batch_size, nhid, nclass):
    f32 = jnp.float32
    emb = params["embed"]
    gru_in = emb.shape[1]

    # tiny gathers / concats / casts stay in plain XLA, outside the kernel
    su_sm = emb[smiles[0]].astype(f32)          # (L, 100)
    sv_sm = emb[smiles[5]].astype(f32)          # (L, 100)
    sm_all = jnp.concatenate([su_sm, sv_sm], axis=0)
    smlen = su_sm.shape[0]

    b, nu, nfeat = solute_meth.shape
    _, nv, _ = solvent_meth.shape
    x_all = jnp.concatenate(
        [solute_meth.reshape(b * nu, nfeat), solvent_meth.reshape(b * nv, nfeat)],
        axis=0).astype(f32)                     # (Ntot, nfeat)

    n1, n2 = b * nu, b * nv
    adj_all = jnp.zeros((n1 + n2, n1 + n2), f32)
    adj_all = adj_all.at[:n1, :n1].set(solute_adj.astype(f32))
    adj_all = adj_all.at[n1:, n1:].set(solvent_adj_meth.astype(f32))

    # node -> graph one-hot (solute graphs 0..B-1, solvent graphs B..2B-1)
    seg_ids = jnp.concatenate(
        [jnp.repeat(jnp.arange(batch_size), nu),
         batch_size + jnp.repeat(jnp.arange(batch_size), nv)])
    g_mat = jax.nn.one_hot(seg_ids, 2 * batch_size, dtype=f32)   # (Ntot, 2B)
    gt_mat = g_mat.T                                             # (2B, Ntot)

    layout, _ = make_layout(nfeat, nhid, nclass, gru_in)
    dims = dict(batch=batch_size, nclass=nclass, nhid=nhid, smlen=smlen)
    kernel = functools.partial(_fused_forward_kernel, dims, layout)

    args = (x_all, adj_all, g_mat, gt_mat, sm_all, params["wide"], params["narrow"])
    return pl.pallas_call(
        kernel,
        out_shape=jax.ShapeDtypeStruct((batch_size, 1), f32),
        in_specs=[VMEM] * len(args),
        out_specs=VMEM,
    )(*args)


forward_jit = jax.jit(forward, static_argnames=("batch_size", "nhid", "nclass"))


# --------------------------------------------------------------------------
if __name__ == "__main__":
    B = 2          # batch_size
    NFEAT = 16
    NHID = 32
    NCLASS = 8
    NU, NV, L = 8, 12, 10  # solute nodes/graph, solvent nodes/graph, smiles length

    key = jax.random.PRNGKey(0)
    kp, k1, k2, k3, k4, k5 = jax.random.split(key, 6)
    params = init_params(kp, NFEAT, NHID, NCLASS)

    solute_meth = jax.random.normal(k1, (B, NU, NFEAT), jnp.float32)
    solvent_meth = jax.random.normal(k2, (B, NV, NFEAT), jnp.float32)

    def block_diag_adj(k, b, n):
        # random per-graph adjacency with self loops, block-diagonal over the batch
        a = (jax.random.uniform(k, (b, n, n)) < 0.4).astype(jnp.float32)
        a = jnp.maximum(a, jnp.eye(n, dtype=jnp.float32))
        full = jnp.zeros((b * n, b * n), jnp.float32)
        for i in range(b):
            full = full.at[i * n:(i + 1) * n, i * n:(i + 1) * n].set(a[i])
        return full

    solute_adj = block_diag_adj(k3, B, NU)        # (16, 16)
    solvent_adj_meth = block_diag_adj(k4, B, NV)  # (24, 24)
    smiles = jax.random.randint(k5, (6, L), 0, 100)

    out = forward_jit(params, solute_adj, solute_meth, solvent_meth,
                      solvent_adj_meth, smiles,
                      batch_size=B, nhid=NHID, nclass=NCLASS)
    out = jax.block_until_ready(out)
    assert out.shape == (B, 1) and out.dtype == jnp.float32
    print("KERNEL_OK")
</pallas_src>

<mosaic_0001>
module attributes {stable_mosaic.version = 11 : i64} {
  func.func @_fused_forward_kernel(%arg0: memref<40x16xf32, #tpu.memory_space<vmem>>, %arg1: memref<40x40xf32, #tpu.memory_space<vmem>>, %arg2: memref<40x4xf32, #tpu.memory_space<vmem>>, %arg3: memref<4x40xf32, #tpu.memory_space<vmem>>, %arg4: memref<20x100xf32, #tpu.memory_space<vmem>>, %arg5: memref<155x512xf32, #tpu.memory_space<vmem>>, %arg6: memref<207x128xf32, #tpu.memory_space<vmem>>, %arg7: memref<2x1xf32, #tpu.memory_space<vmem>>) attributes {dimension_semantics = [], scalar_prefetch = 0 : i64, scratch_operands = 0 : i64, tpu.core_type = #tpu.core_type<tc>} {
    %c0 = arith.constant 0 : index
    %c0_0 = arith.constant 0 : index
    %0 = vector.load %arg0[%c0, %c0_0] : memref<40x16xf32, #tpu.memory_space<vmem>>, vector<40x16xf32>
    %c0_1 = arith.constant 0 : index
    %c0_2 = arith.constant 0 : index
    %1 = vector.load %arg1[%c0_1, %c0_2] : memref<40x40xf32, #tpu.memory_space<vmem>>, vector<40x40xf32>
    %cst = arith.constant 0.000000e+00 : f32
    %2 = vector.broadcast %cst : f32 to vector<40x40xf32>
    %3 = arith.cmpf ogt, %1, %2 : vector<40x40xf32>
    %c0_3 = arith.constant 0 : index
    %c0_4 = arith.constant 0 : index
    %4 = vector.load %arg2[%c0_3, %c0_4] : memref<40x4xf32, #tpu.memory_space<vmem>>, vector<40x4xf32>
    %c0_5 = arith.constant 0 : index
    %c0_6 = arith.constant 0 : index
    %5 = vector.load %arg3[%c0_5, %c0_6] : memref<4x40xf32, #tpu.memory_space<vmem>>, vector<4x40xf32>
    %c0_7 = arith.constant 0 : index
    %c0_8 = arith.constant 0 : index
    %6 = vector.load %arg4[%c0_7, %c0_8] : memref<20x100xf32, #tpu.memory_space<vmem>>, vector<20x100xf32>
    %c16 = arith.constant 16 : index
    %c0_9 = arith.constant 0 : index
    %7 = vector.load %arg6[%c16, %c0_9] : memref<207x128xf32, #tpu.memory_space<vmem>>, vector<16x8xf32>
    %cst_10 = arith.constant dense<0.000000e+00> : vector<40x8xf32>
    %8 = tpu.matmul %0, %7, %cst_10 {dimension_numbers = #tpu.dot_dimension_numbers<[1], [0], [0], [1], [0, 0, 1, 1], [], []>} : vector<40x16xf32>, vector<16x8xf32>, vector<40x8xf32> -> vector<40x8xf32>
    %c201 = arith.constant 201 : index
    %c0_11 = arith.constant 0 : index
    %9 = vector.load %arg6[%c201, %c0_11] : memref<207x128xf32, #tpu.memory_space<vmem>>, vector<1x8xf32>
    %10 = vector.broadcast %9 : vector<1x8xf32> to vector<40x8xf32>
    %11 = arith.addf %8, %10 : vector<40x8xf32>
    %c0_12 = arith.constant 0 : index
    %c0_13 = arith.constant 0 : index
    %12 = vector.load %arg6[%c0_12, %c0_13] : memref<207x128xf32, #tpu.memory_space<vmem>>, vector<16x128xf32>
    %c200 = arith.constant 200 : index
    %c0_14 = arith.constant 0 : index
    %13 = vector.load %arg6[%c200, %c0_14] : memref<207x128xf32, #tpu.memory_space<vmem>>, vector<1x128xf32>
    %cst_15 = arith.constant dense<0.000000e+00> : vector<40x128xf32>
    %14 = tpu.matmul %0, %12, %cst_15 {dimension_numbers = #tpu.dot_dimension_numbers<[1], [0], [0], [1], [0, 0, 1, 1], [], []>} : vector<40x16xf32>, vector<16x128xf32>, vector<40x128xf32> -> vector<40x128xf32>
    %15 = vector.broadcast %13 : vector<1x128xf32> to vector<40x128xf32>
    %16 = arith.addf %14, %15 : vector<40x128xf32>
    %17 = vector.extract_strided_slice %16 {offsets = [0, 0], sizes = [40, 32], strides = [1, 1]} : vector<40x128xf32> to vector<40x32xf32>
    %18 = vector.extract_strided_slice %16 {offsets = [0, 32], sizes = [40, 32], strides = [1, 1]} : vector<40x128xf32> to vector<40x32xf32>
    %19 = vector.extract_strided_slice %16 {offsets = [0, 64], sizes = [40, 32], strides = [1, 1]} : vector<40x128xf32> to vector<40x32xf32>
    %20 = vector.extract_strided_slice %16 {offsets = [0, 96], sizes = [40, 32], strides = [1, 1]} : vector<40x128xf32> to vector<40x32xf32>
    %cst_16 = arith.constant dense<0.000000e+00> : vector<40x40xf32>
    %21 = tpu.matmul %17, %18, %cst_16 {dimension_numbers = #tpu.dot_dimension_numbers<[1], [1], [0], [0], [0, 0, 1, 0], [], []>} : vector<40x32xf32>, vector<40x32xf32>, vector<40x40xf32> -> vector<40x40xf32>
    %cst_17 = arith.constant 0.176776692 : f32
    %22 = vector.broadcast %cst_17 : f32 to vector<40x40xf32>
    %23 = arith.mulf %21, %22 : vector<40x40xf32>
    %cst_18 = arith.constant -1.000000e+30 : f32
    %24 = vector.broadcast %cst_18 : f32 to vector<40x40xf32>
    %25 = arith.select %3, %23, %24 : vector<40x40xi1>, vector<40x40xf32>
    %cst_19 = arith.constant dense<0xFF800000> : vector<40xf32>
    %26 = vector.multi_reduction <maximumf>, %25, %cst_19 [1] : vector<40x40xf32> to vector<40xf32>
    %27 = vector.shape_cast %26 : vector<40xf32> to vector<40x1xf32>
    %28 = vector.broadcast %27 : vector<40x1xf32> to vector<40x40xf32>
    %29 = arith.subf %23, %28 : vector<40x40xf32>
    %cst_20 = arith.constant 0.000000e+00 : f32
    %30 = vector.broadcast %cst_20 : f32 to vector<40x40xf32>
    %31 = arith.minimumf %29, %30 : vector<40x40xf32>
    %32 = math.exp %31 : vector<40x40xf32>
    %cst_21 = arith.constant 0.000000e+00 : f32
    %33 = vector.broadcast %cst_21 : f32 to vector<40x40xf32>
    %34 = arith.select %3, %32, %33 : vector<40x40xi1>, vector<40x40xf32>
    %cst_22 = arith.constant dense<0.000000e+00> : vector<40xf32>
    %35 = vector.multi_reduction <add>, %34, %cst_22 [1] : vector<40x40xf32> to vector<40xf32>
    %36 = vector.shape_cast %35 : vector<40xf32> to vector<40x1xf32>
    %cst_23 = arith.constant 0.000000e+00 : f32
    %37 = vector.broadcast %cst_23 : f32 to vector<40x1xf32>
    %38 = arith.cmpf ogt, %36, %37 : vector<40x1xf32>
    %cst_24 = arith.constant 1.000000e+00 : f32
    %39 = vector.broadcast %cst_24 : f32 to vector<40x1xf32>
    %40 = arith.select %38, %36, %39 : vector<40x1xi1>, vector<40x1xf32>
    %41 = tpu.reciprocal %40 {approx = true} : vector<40x1xf32> -> vector<40x1xf32>
    %42 = vector.broadcast %41 : vector<40x1xf32> to vector<40x40xf32>
    %43 = arith.mulf %34, %42 : vector<40x40xf32>
    %cst_25 = arith.constant dense<0.000000e+00> : vector<40x32xf32>
    %44 = tpu.matmul %43, %19, %cst_25 {dimension_numbers = #tpu.dot_dimension_numbers<[1], [0], [0], [1], [0, 0, 1, 1], [], []>} : vector<40x40xf32>, vector<40x32xf32>, vector<40x32xf32> -> vector<40x32xf32>
    %45 = arith.addf %44, %20 : vector<40x32xf32>
    %cst_26 = arith.constant 0.000000e+00 : f32
    %46 = vector.broadcast %cst_26 : f32 to vector<40x32xf32>
    %47 = arith.maximumf %45, %46 : vector<40x32xf32>
    %c104 = arith.constant 104 : index
    %c0_27 = arith.constant 0 : index
    %48 = vector.load %arg5[%c104, %c0_27] : memref<155x512xf32, #tpu.memory_space<vmem>>, vector<32x512xf32>
    %c153 = arith.constant 153 : index
    %c0_28 = arith.constant 0 : index
    %49 = vector.load %arg5[%c153, %c0_28] : memref<155x512xf32, #tpu.memory_space<vmem>>, vector<1x512xf32>
    %cst_29 = arith.constant dense<0.000000e+00> : vector<40x512xf32>
    %50 = tpu.matmul %47, %48, %cst_29 {dimension_numbers = #tpu.dot_dimension_numbers<[1], [0], [0], [1], [0, 0, 1, 1], [], []>} : vector<40x32xf32>, vector<32x512xf32>, vector<40x512xf32> -> vector<40x512xf32>
    %51 = vector.broadcast %49 : vector<1x512xf32> to vector<40x512xf32>
    %52 = arith.addf %50, %51 : vector<40x512xf32>
    %53 = vector.extract_strided_slice %52 {offsets = [0, 0], sizes = [40, 8], strides = [1, 1]} : vector<40x512xf32> to vector<40x8xf32>
    %54 = vector.extract_strided_slice %52 {offsets = [0, 128], sizes = [40, 8], strides = [1, 1]} : vector<40x512xf32> to vector<40x8xf32>
    %55 = vector.extract_strided_slice %52 {offsets = [0, 256], sizes = [40, 8], strides = [1, 1]} : vector<40x512xf32> to vector<40x8xf32>
    %56 = vector.extract_strided_slice %52 {offsets = [0, 384], sizes = [40, 8], strides = [1, 1]} : vector<40x512xf32> to vector<40x8xf32>
    %cst_30 = arith.constant dense<0.000000e+00> : vector<40x40xf32>
    %57 = tpu.matmul %53, %54, %cst_30 {dimension_numbers = #tpu.dot_dimension_numbers<[1], [1], [0], [0], [0, 0, 1, 0], [], []>} : vector<40x8xf32>, vector<40x8xf32>, vector<40x40xf32> -> vector<40x40xf32>
    %cst_31 = arith.constant 0.353553385 : f32
    %58 = vector.broadcast %cst_31 : f32 to vector<40x40xf32>
    %59 = arith.mulf %57, %58 : vector<40x40xf32>
    %cst_32 = arith.constant -1.000000e+30 : f32
    %60 = vector.broadcast %cst_32 : f32 to vector<40x40xf32>
    %61 = arith.select %3, %59, %60 : vector<40x40xi1>, vector<40x40xf32>
    %cst_33 = arith.constant dense<0xFF800000> : vector<40xf32>
    %62 = vector.multi_reduction <maximumf>, %61, %cst_33 [1] : vector<40x40xf32> to vector<40xf32>
    %63 = vector.shape_cast %62 : vector<40xf32> to vector<40x1xf32>
    %64 = vector.broadcast %63 : vector<40x1xf32> to vector<40x40xf32>
    %65 = arith.subf %59, %64 : vector<40x40xf32>
    %cst_34 = arith.constant 0.000000e+00 : f32
    %66 = vector.broadcast %cst_34 : f32 to vector<40x40xf32>
    %67 = arith.minimumf %65, %66 : vector<40x40xf32>
    %68 = math.exp %67 : vector<40x40xf32>
    %cst_35 = arith.constant 0.000000e+00 : f32
    %69 = vector.broadcast %cst_35 : f32 to vector<40x40xf32>
    %70 = arith.select %3, %68, %69 : vector<40x40xi1>, vector<40x40xf32>
    %cst_36 = arith.constant dense<0.000000e+00> : vector<40xf32>
    %71 = vector.multi_reduction <add>, %70, %cst_36 [1] : vector<40x40xf32> to vector<40xf32>
    %72 = vector.shape_cast %71 : vector<40xf32> to vector<40x1xf32>
    %cst_37 = arith.constant 0.000000e+00 : f32
    %73 = vector.broadcast %cst_37 : f32 to vector<40x1xf32>
    %74 = arith.cmpf ogt, %72, %73 : vector<40x1xf32>
    %cst_38 = arith.constant 1.000000e+00 : f32
    %75 = vector.broadcast %cst_38 : f32 to vector<40x1xf32>
    %76 = arith.select %74, %72, %75 : vector<40x1xi1>, vector<40x1xf32>
    %77 = tpu.reciprocal %76 {approx = true} : vector<40x1xf32> -> vector<40x1xf32>
    %78 = vector.broadcast %77 : vector<40x1xf32> to vector<40x40xf32>
    %79 = arith.mulf %70, %78 : vector<40x40xf32>
    %cst_39 = arith.constant dense<0.000000e+00> : vector<40x8xf32>
    %80 = tpu.matmul %79, %55, %cst_39 {dimension_numbers = #tpu.dot_dimension_numbers<[1], [0], [0], [1], [0, 0, 1, 1], [], []>} : vector<40x40xf32>, vector<40x8xf32>, vector<40x8xf32> -> vector<40x8xf32>
    %81 = arith.addf %80, %56 : vector<40x8xf32>
    %82 = arith.addf %81, %11 : vector<40x8xf32>
    %c136 = arith.constant 136 : index
    %c0_40 = arith.constant 0 : index
    %83 = vector.load %arg5[%c136, %c0_40] : memref<155x512xf32, #tpu.memory_space<vmem>>, vector<8x512xf32>
    %c144 = arith.constant 144 : index
    %c0_41 = arith.constant 0 : index
    %84 = vector.load %arg5[%c144, %c0_41] : memref<155x512xf32, #tpu.memory_space<vmem>>, vector<8x512xf32>
    %c154 = arith.constant 154 : index
    %c0_42 = arith.constant 0 : index
    %85 = vector.load %arg5[%c154, %c0_42] : memref<155x512xf32, #tpu.memory_space<vmem>>, vector<1x512xf32>
    %cst_43 = arith.constant 0.000000e+00 : f32
    %86 = vector.broadcast %cst_43 : f32 to vector<4x8xf32>
    %cst_44 = arith.constant 0.000000e+00 : f32
    %87 = vector.broadcast %cst_44 : f32 to vector<4x8xf32>
    %cst_45 = arith.constant 0.000000e+00 : f32
    %88 = vector.broadcast %cst_45 : f32 to vector<4x8xf32>
    %cst_46 = arith.constant dense<0.000000e+00> : vector<4x512xf32>
    %89 = tpu.matmul %86, %83, %cst_46 {dimension_numbers = #tpu.dot_dimension_numbers<[1], [0], [0], [1], [0, 0, 1, 1], [], []>} : vector<4x8xf32>, vector<8x512xf32>, vector<4x512xf32> -> vector<4x512xf32>
    %cst_47 = arith.constant dense<0.000000e+00> : vector<4x512xf32>
    %90 = tpu.matmul %87, %84, %cst_47 {dimension_numbers = #tpu.dot_dimension_numbers<[1], [0], [0], [1], [0, 0, 1, 1], [], []>} : vector<4x8xf32>, vector<8x512xf32>, vector<4x512xf32> -> vector<4x512xf32>
    %91 = arith.addf %89, %90 : vector<4x512xf32>
    %92 = vector.broadcast %85 : vector<1x512xf32> to vector<4x512xf32>
    %93 = arith.addf %91, %92 : vector<4x512xf32>
    %94 = vector.extract_strided_slice %93 {offsets = [0, 0], sizes = [4, 8], strides = [1, 1]} : vector<4x512xf32> to vector<4x8xf32>
    %95 = arith.negf %94 : vector<4x8xf32>
    %96 = math.exp %95 : vector<4x8xf32>
    %cst_48 = arith.constant 1.000000e+00 : f32
    %97 = vector.broadcast %cst_48 : f32 to vector<4x8xf32>
    %98 = arith.addf %97, %96 : vector<4x8xf32>
    %99 = arith.divf %97, %98 : vector<4x8xf32>
    %100 = vector.extract_strided_slice %93 {offsets = [0, 128], sizes = [4, 8], strides = [1, 1]} : vector<4x512xf32> to vector<4x8xf32>
    %101 = arith.negf %100 : vector<4x8xf32>
    %102 = math.exp %101 : vector<4x8xf32>
    %cst_49 = arith.constant 1.000000e+00 : f32
    %103 = vector.broadcast %cst_49 : f32 to vector<4x8xf32>
    %104 = arith.addf %103, %102 : vector<4x8xf32>
    %105 = arith.divf %103, %104 : vector<4x8xf32>
    %106 = vector.extract_strided_slice %93 {offsets = [0, 256], sizes = [4, 8], strides = [1, 1]} : vector<4x512xf32> to vector<4x8xf32>
    %107 = math.tanh %106 : vector<4x8xf32>
    %108 = vector.extract_strided_slice %93 {offsets = [0, 384], sizes = [4, 8], strides = [1, 1]} : vector<4x512xf32> to vector<4x8xf32>
    %109 = arith.negf %108 : vector<4x8xf32>
    %110 = math.exp %109 : vector<4x8xf32>
    %cst_50 = arith.constant 1.000000e+00 : f32
    %111 = vector.broadcast %cst_50 : f32 to vector<4x8xf32>
    %112 = arith.addf %111, %110 : vector<4x8xf32>
    %113 = arith.divf %111, %112 : vector<4x8xf32>
    %114 = arith.mulf %105, %88 : vector<4x8xf32>
    %115 = arith.mulf %99, %107 : vector<4x8xf32>
    %116 = arith.addf %114, %115 : vector<4x8xf32>
    %117 = math.tanh %116 : vector<4x8xf32>
    %118 = arith.mulf %113, %117 : vector<4x8xf32>
    %cst_51 = arith.constant dense<0.000000e+00> : vector<40x8xf32>
    %119 = tpu.matmul %4, %118, %cst_51 {dimension_numbers = #tpu.dot_dimension_numbers<[1], [0], [0], [1], [0, 0, 1, 1], [], []>} : vector<40x4xf32>, vector<4x8xf32>, vector<40x8xf32> -> vector<40x8xf32>
    %120 = arith.mulf %82, %119 : vector<40x8xf32>
    %cst_52 = arith.constant dense<0.000000e+00> : vector<40xf32>
    %121 = vector.multi_reduction <add>, %120, %cst_52 [1] : vector<40x8xf32> to vector<40xf32>
    %122 = vector.shape_cast %121 : vector<40xf32> to vector<40x1xf32>
    %cst_53 = arith.constant 5.000000e-01 : f32
    %123 = vector.broadcast %cst_53 : f32 to vector<40x4xf32>
    %124 = arith.cmpf ogt, %4, %123 : vector<40x4xf32>
    %cst_54 = arith.constant -1.000000e+30 : f32
    %125 = vector.shape_cast %122 : vector<40x1xf32> to vector<40x1xf32>
    %126 = vector.broadcast %125 : vector<40x1xf32> to vector<40x4xf32>
    %127 = vector.broadcast %cst_54 : f32 to vector<40x4xf32>
    %128 = arith.select %124, %126, %127 : vector<40x4xi1>, vector<40x4xf32>
    %cst_55 = arith.constant dense<0xFF800000> : vector<4xf32>
    %129 = vector.multi_reduction <maximumf>, %128, %cst_55 [0] : vector<40x4xf32> to vector<4xf32>
    %130 = vector.shape_cast %129 : vector<4xf32> to vector<1x4xf32>
    %131 = vector.broadcast %130 : vector<1x4xf32> to vector<40x4xf32>
    %132 = arith.mulf %4, %131 : vector<40x4xf32>
    %cst_56 = arith.constant dense<0.000000e+00> : vector<40xf32>
    %133 = vector.multi_reduction <add>, %132, %cst_56 [1] : vector<40x4xf32> to vector<40xf32>
    %134 = vector.shape_cast %133 : vector<40xf32> to vector<40x1xf32>
    %135 = arith.subf %122, %134 : vector<40x1xf32>
    %136 = math.exp %135 : vector<40x1xf32>
    %137 = vector.broadcast %136 : vector<40x1xf32> to vector<40x4xf32>
    %138 = arith.mulf %4, %137 : vector<40x4xf32>
    %cst_57 = arith.constant dense<0.000000e+00> : vector<4xf32>
    %139 = vector.multi_reduction <add>, %138, %cst_57 [0] : vector<40x4xf32> to vector<4xf32>
    %140 = vector.shape_cast %139 : vector<4xf32> to vector<1x4xf32>
    %141 = vector.broadcast %140 : vector<1x4xf32> to vector<40x4xf32>
    %142 = arith.mulf %4, %141 : vector<40x4xf32>
    %cst_58 = arith.constant dense<0.000000e+00> : vector<40xf32>
    %143 = vector.multi_reduction <add>, %142, %cst_58 [1] : vector<40x4xf32> to vector<40xf32>
    %144 = vector.shape_cast %143 : vector<40xf32> to vector<40x1xf32>
    %145 = tpu.reciprocal %144 {approx = true} : vector<40x1xf32> -> vector<40x1xf32>
    %146 = arith.mulf %136, %145 : vector<40x1xf32>
    %147 = vector.broadcast %146 : vector<40x1xf32> to vector<40x8xf32>
    %148 = arith.mulf %147, %82 : vector<40x8xf32>
    %cst_59 = arith.constant dense<0.000000e+00> : vector<4x8xf32>
    %149 = tpu.matmul %5, %148, %cst_59 {dimension_numbers = #tpu.dot_dimension_numbers<[1], [0], [0], [1], [0, 0, 1, 1], [], []>} : vector<4x40xf32>, vector<40x8xf32>, vector<4x8xf32> -> vector<4x8xf32>
    %cst_60 = arith.constant dense<0.000000e+00> : vector<4x512xf32>
    %150 = tpu.matmul %118, %83, %cst_60 {dimension_numbers = #tpu.dot_dimension_numbers<[1], [0], [0], [1], [0, 0, 1, 1], [], []>} : vector<4x8xf32>, vector<8x512xf32>, vector<4x512xf32> -> vector<4x512xf32>
    %cst_61 = arith.constant dense<0.000000e+00> : vector<4x512xf32>
    %151 = tpu.matmul %149, %84, %cst_61 {dimension_numbers = #tpu.dot_dimension_numbers<[1], [0], [0], [1], [0, 0, 1, 1], [], []>} : vector<4x8xf32>, vector<8x512xf32>, vector<4x512xf32> -> vector<4x512xf32>
    %152 = arith.addf %150, %151 : vector<4x512xf32>
    %153 = vector.broadcast %85 : vector<1x512xf32> to vector<4x512xf32>
    %154 = arith.addf %152, %153 : vector<4x512xf32>
    %155 = vector.extract_strided_slice %154 {offsets = [0, 0], sizes = [4, 8], strides = [1, 1]} : vector<4x512xf32> to vector<4x8xf32>
    %156 = arith.negf %155 : vector<4x8xf32>
    %157 = math.exp %156 : vector<4x8xf32>
    %cst_62 = arith.constant 1.000000e+00 : f32
    %158 = vector.broadcast %cst_62 : f32 to vector<4x8xf32>
    %159 = arith.addf %158, %157 : vector<4x8xf32>
    %160 = arith.divf %158, %159 : vector<4x8xf32>
    %161 = vector.extract_strided_slice %154 {offsets = [0, 128], sizes = [4, 8], strides = [1, 1]} : vector<4x512xf32> to vector<4x8xf32>
    %162 = arith.negf %161 : vector<4x8xf32>
    %163 = math.exp %162 : vector<4x8xf32>
    %cst_63 = arith.constant 1.000000e+00 : f32
    %164 = vector.broadcast %cst_63 : f32 to vector<4x8xf32>
    %165 = arith.addf %164, %163 : vector<4x8xf32>
    %166 = arith.divf %164, %165 : vector<4x8xf32>
    %167 = vector.extract_strided_slice %154 {offsets = [0, 256], sizes = [4, 8], strides = [1, 1]} : vector<4x512xf32> to vector<4x8xf32>
    %168 = math.tanh %167 : vector<4x8xf32>
    %169 = vector.extract_strided_slice %154 {offsets = [0, 384], sizes = [4, 8], strides = [1, 1]} : vector<4x512xf32> to vector<4x8xf32>
    %170 = arith.negf %169 : vector<4x8xf32>
    %171 = math.exp %170 : vector<4x8xf32>
    %cst_64 = arith.constant 1.000000e+00 : f32
    %172 = vector.broadcast %cst_64 : f32 to vector<4x8xf32>
    %173 = arith.addf %172, %171 : vector<4x8xf32>
    %174 = arith.divf %172, %173 : vector<4x8xf32>
    %175 = arith.mulf %166, %116 : vector<4x8xf32>
    %176 = arith.mulf %160, %168 : vector<4x8xf32>
    %177 = arith.addf %175, %176 : vector<4x8xf32>
    %178 = math.tanh %177 : vector<4x8xf32>
    %179 = arith.mulf %174, %178 : vector<4x8xf32>
    %cst_65 = arith.constant dense<0.000000e+00> : vector<40x8xf32>
    %180 = tpu.matmul %4, %179, %cst_65 {dimension_numbers = #tpu.dot_dimension_numbers<[1], [0], [0], [1], [0, 0, 1, 1], [], []>} : vector<40x4xf32>, vector<4x8xf32>, vector<40x8xf32> -> vector<40x8xf32>
    %181 = arith.mulf %82, %180 : vector<40x8xf32>
    %cst_66 = arith.constant dense<0.000000e+00> : vector<40xf32>
    %182 = vector.multi_reduction <add>, %181, %cst_66 [1] : vector<40x8xf32> to vector<40xf32>
    %183 = vector.shape_cast %182 : vector<40xf32> to vector<40x1xf32>
    %cst_67 = arith.constant 5.000000e-01 : f32
    %184 = vector.broadcast %cst_67 : f32 to vector<40x4xf32>
    %185 = arith.cmpf ogt, %4, %184 : vector<40x4xf32>
    %cst_68 = arith.constant -1.000000e+30 : f32
    %186 = vector.shape_cast %183 : vector<40x1xf32> to vector<40x1xf32>
    %187 = vector.broadcast %186 : vector<40x1xf32> to vector<40x4xf32>
    %188 = vector.broadcast %cst_68 : f32 to vector<40x4xf32>
    %189 = arith.select %185, %187, %188 : vector<40x4xi1>, vector<40x4xf32>
    %cst_69 = arith.constant dense<0xFF800000> : vector<4xf32>
    %190 = vector.multi_reduction <maximumf>, %189, %cst_69 [0] : vector<40x4xf32> to vector<4xf32>
    %191 = vector.shape_cast %190 : vector<4xf32> to vector<1x4xf32>
    %192 = vector.broadcast %191 : vector<1x4xf32> to vector<40x4xf32>
    %193 = arith.mulf %4, %192 : vector<40x4xf32>
    %cst_70 = arith.constant dense<0.000000e+00> : vector<40xf32>
    %194 = vector.multi_reduction <add>, %193, %cst_70 [1] : vector<40x4xf32> to vector<40xf32>
    %195 = vector.shape_cast %194 : vector<40xf32> to vector<40x1xf32>
    %196 = arith.subf %183, %195 : vector<40x1xf32>
    %197 = math.exp %196 : vector<40x1xf32>
    %198 = vector.broadcast %197 : vector<40x1xf32> to vector<40x4xf32>
    %199 = arith.mulf %4, %198 : vector<40x4xf32>
    %cst_71 = arith.constant dense<0.000000e+00> : vector<4xf32>
    %200 = vector.multi_reduction <add>, %199, %cst_71 [0] : vector<40x4xf32> to vector<4xf32>
    %201 = vector.shape_cast %200 : vector<4xf32> to vector<1x4xf32>
    %202 = vector.broadcast %201 : vector<1x4xf32> to vector<40x4xf32>
    %203 = arith.mulf %4, %202 : vector<40x4xf32>
    %cst_72 = arith.constant dense<0.000000e+00> : vector<40xf32>
    %204 = vector.multi_reduction <add>, %203, %cst_72 [1] : vector<40x4xf32> to vector<40xf32>
    %205 = vector.shape_cast %204 : vector<40xf32> to vector<40x1xf32>
    %206 = tpu.reciprocal %205 {approx = true} : vector<40x1xf32> -> vector<40x1xf32>
    %207 = arith.mulf %197, %206 : vector<40x1xf32>
    %208 = vector.broadcast %207 : vector<40x1xf32> to vector<40x8xf32>
    %209 = arith.mulf %208, %82 : vector<40x8xf32>
    %cst_73 = arith.constant dense<0.000000e+00> : vector<4x8xf32>
    %210 = tpu.matmul %5, %209, %cst_73 {dimension_numbers = #tpu.dot_dimension_numbers<[1], [0], [0], [1], [0, 0, 1, 1], [], []>} : vector<4x40xf32>, vector<40x8xf32>, vector<4x8xf32> -> vector<4x8xf32>
    %c0_74 = arith.constant 0 : index
    %c0_75 = arith.constant 0 : index
    %211 = vector.load %arg5[%c0_74, %c0_75] : memref<155x512xf32, #tpu.memory_space<vmem>>, vector<100x384xf32>
    %cst_76 = arith.constant dense<0.000000e+00> : vector<20x384xf32>
    %212 = tpu.matmul %6, %211, %cst_76 {dimension_numbers = #tpu.dot_dimension_numbers<[1], [0], [0], [1], [0, 0, 1, 1], [], []>} : vector<20x100xf32>, vector<100x384xf32>, vector<20x384xf32> -> vector<20x384xf32>
    %c152 = arith.constant 152 : index
    %c0_77 = arith.constant 0 : index
    %213 = vector.load %arg5[%c152, %c0_77] : memref<155x512xf32, #tpu.memory_space<vmem>>, vector<1x384xf32>
    %214 = vector.broadcast %213 : vector<1x384xf32> to vector<20x384xf32>
    %215 = arith.addf %212, %214 : vector<20x384xf32>
    %216 = vector.extract_strided_slice %215 {offsets = [0, 0], sizes = [20, 16], strides = [1, 1]} : vector<20x384xf32> to vector<20x16xf32>
    %217 = arith.negf %216 : vector<20x16xf32>
    %218 = math.exp %217 : vector<20x16xf32>
    %cst_78 = arith.constant 1.000000e+00 : f32
    %219 = vector.broadcast %cst_78 : f32 to vector<20x16xf32>
    %220 = arith.addf %219, %218 : vector<20x16xf32>
    %221 = arith.divf %219, %220 : vector<20x16xf32>
    %222 = vector.extract_strided_slice %215 {offsets = [0, 128], sizes = [20, 16], strides = [1, 1]} : vector<20x384xf32> to vector<20x16xf32>
    %223 = arith.negf %222 : vector<20x16xf32>
    %224 = math.exp %223 : vector<20x16xf32>
    %cst_79 = arith.constant 1.000000e+00 : f32
    %225 = vector.broadcast %cst_79 : f32 to vector<20x16xf32>
    %226 = arith.addf %225, %224 : vector<20x16xf32>
    %227 = arith.divf %225, %226 : vector<20x16xf32>
    %228 = vector.extract_strided_slice %215 {offsets = [0, 256], sizes = [20, 16], strides = [1, 1]} : vector<20x384xf32> to vector<20x16xf32>
    %c206 = arith.constant 206 : index
    %c0_80 = arith.constant 0 : index
    %229 = vector.load %arg6[%c206, %c0_80] : memref<207x128xf32, #tpu.memory_space<vmem>>, vector<1x16xf32>
    %230 = vector.broadcast %229 : vector<1x16xf32> to vector<20x16xf32>
    %231 = arith.mulf %221, %230 : vector<20x16xf32>
    %232 = arith.addf %228, %231 : vector<20x16xf32>
    %233 = math.tanh %232 : vector<20x16xf32>
    %cst_81 = arith.constant 1.000000e+00 : f32
    %234 = vector.broadcast %cst_81 : f32 to vector<20x16xf32>
    %235 = arith.subf %234, %227 : vector<20x16xf32>
    %236 = arith.mulf %235, %233 : vector<20x16xf32>
    %cst_82 = arith.constant 0.000000e+00 : f32
    %237 = vector.broadcast %cst_82 : f32 to vector<20x16xf32>
    %238 = arith.maximumf %236, %237 : vector<20x16xf32>
    %239 = vector.extract_strided_slice %238 {offsets = [0, 0], sizes = [10, 16], strides = [1, 1]} : vector<20x16xf32> to vector<10x16xf32>
    %cst_83 = arith.constant dense<0.000000e+00> : vector<16xf32>
    %240 = vector.multi_reduction <add>, %239, %cst_83 [0] : vector<10x16xf32> to vector<16xf32>
    %241 = vector.shape_cast %240 : vector<16xf32> to vector<1x16xf32>
    %cst_84 = arith.constant 1.000000e+01 : f32
    %242 = vector.broadcast %cst_84 : f32 to vector<1x16xf32>
    %243 = arith.divf %241, %242 : vector<1x16xf32>
    %244 = vector.shape_cast %243 : vector<1x16xf32> to vector<1x16xf32>
    %245 = vector.broadcast %244 : vector<1x16xf32> to vector<2x16xf32>
    %246 = vector.extract_strided_slice %238 {offsets = [10, 0], sizes = [10, 16], strides = [1, 1]} : vector<20x16xf32> to vector<10x16xf32>
    %cst_85 = arith.constant dense<0.000000e+00> : vector<16xf32>
    %247 = vector.multi_reduction <add>, %246, %cst_85 [0] : vector<10x16xf32> to vector<16xf32>
    %248 = vector.shape_cast %247 : vector<16xf32> to vector<1x16xf32>
    %cst_86 = arith.constant 1.000000e+01 : f32
    %249 = vector.broadcast %cst_86 : f32 to vector<1x16xf32>
    %250 = arith.divf %248, %249 : vector<1x16xf32>
    %251 = vector.shape_cast %250 : vector<1x16xf32> to vector<1x16xf32>
    %252 = vector.broadcast %251 : vector<1x16xf32> to vector<2x16xf32>
    %253 = vector.extract_strided_slice %179 {offsets = [0, 0], sizes = [2, 8], strides = [1, 1]} : vector<4x8xf32> to vector<2x8xf32>
    %254 = vector.extract_strided_slice %210 {offsets = [0, 0], sizes = [2, 8], strides = [1, 1]} : vector<4x8xf32> to vector<2x8xf32>
    %255 = vector.extract_strided_slice %179 {offsets = [2, 0], sizes = [2, 8], strides = [1, 1]} : vector<4x8xf32> to vector<2x8xf32>
    %256 = vector.extract_strided_slice %210 {offsets = [2, 0], sizes = [2, 8], strides = [1, 1]} : vector<4x8xf32> to vector<2x8xf32>
    %257 = tpu.concatenate %253, %254, %245, %255, %256, %252 in 1 : vector<2x8xf32>, vector<2x8xf32>, vector<2x16xf32>, vector<2x8xf32>, vector<2x8xf32>, vector<2x16xf32> -> vector<2x64xf32>
    %c32 = arith.constant 32 : index
    %c0_87 = arith.constant 0 : index
    %258 = vector.load %arg6[%c32, %c0_87] : memref<207x128xf32, #tpu.memory_space<vmem>>, vector<64x8xf32>
    %cst_88 = arith.constant dense<0.000000e+00> : vector<2x8xf32>
    %259 = tpu.matmul %257, %258, %cst_88 {dimension_numbers = #tpu.dot_dimension_numbers<[1], [0], [0], [1], [0, 0, 1, 1], [], []>} : vector<2x64xf32>, vector<64x8xf32>, vector<2x8xf32> -> vector<2x8xf32>
    %c202 = arith.constant 202 : index
    %c0_89 = arith.constant 0 : index
    %260 = vector.load %arg6[%c202, %c0_89] : memref<207x128xf32, #tpu.memory_space<vmem>>, vector<1x8xf32>
    %261 = vector.broadcast %260 : vector<1x8xf32> to vector<2x8xf32>
    %262 = arith.addf %259, %261 : vector<2x8xf32>
    %cst_90 = arith.constant 0.000000e+00 : f32
    %263 = vector.broadcast %cst_90 : f32 to vector<2x8xf32>
    %264 = arith.maximumf %262, %263 : vector<2x8xf32>
    %c96 = arith.constant 96 : index
    %c0_91 = arith.constant 0 : index
    %265 = vector.load %arg6[%c96, %c0_91] : memref<207x128xf32, #tpu.memory_space<vmem>>, vector<8x64xf32>
    %cst_92 = arith.constant dense<0.000000e+00> : vector<2x64xf32>
    %266 = tpu.matmul %264, %265, %cst_92 {dimension_numbers = #tpu.dot_dimension_numbers<[1], [0], [0], [1], [0, 0, 1, 1], [], []>} : vector<2x8xf32>, vector<8x64xf32>, vector<2x64xf32> -> vector<2x64xf32>
    %c203 = arith.constant 203 : index
    %c0_93 = arith.constant 0 : index
    %267 = vector.load %arg6[%c203, %c0_93] : memref<207x128xf32, #tpu.memory_space<vmem>>, vector<1x64xf32>
    %268 = vector.broadcast %267 : vector<1x64xf32> to vector<2x64xf32>
    %269 = arith.addf %266, %268 : vector<2x64xf32>
    %cst_94 = arith.constant 0.000000e+00 : f32
    %270 = vector.broadcast %cst_94 : f32 to vector<2x64xf32>
    %271 = arith.maximumf %269, %270 : vector<2x64xf32>
    %c104_95 = arith.constant 104 : index
    %c0_96 = arith.constant 0 : index
    %272 = vector.load %arg6[%c104_95, %c0_96] : memref<207x128xf32, #tpu.memory_space<vmem>>, vector<64x32xf32>
    %cst_97 = arith.constant dense<0.000000e+00> : vector<2x32xf32>
    %273 = tpu.matmul %271, %272, %cst_97 {dimension_numbers = #tpu.dot_dimension_numbers<[1], [0], [0], [1], [0, 0, 1, 1], [], []>} : vector<2x64xf32>, vector<64x32xf32>, vector<2x32xf32> -> vector<2x32xf32>
    %c204 = arith.constant 204 : index
    %c0_98 = arith.constant 0 : index
    %274 = vector.load %arg6[%c204, %c0_98] : memref<207x128xf32, #tpu.memory_space<vmem>>, vector<1x32xf32>
    %275 = vector.broadcast %274 : vector<1x32xf32> to vector<2x32xf32>
    %276 = arith.addf %273, %275 : vector<2x32xf32>
    %cst_99 = arith.constant 0.000000e+00 : f32
    %277 = vector.broadcast %cst_99 : f32 to vector<2x32xf32>
    %278 = arith.maximumf %276, %277 : vector<2x32xf32>
    %c168 = arith.constant 168 : index
    %c0_100 = arith.constant 0 : index
    %279 = vector.load %arg6[%c168, %c0_100] : memref<207x128xf32, #tpu.memory_space<vmem>>, vector<32x1xf32>
    %cst_101 = arith.constant dense<0.000000e+00> : vector<2x1xf32>
    %280 = tpu.matmul %278, %279, %cst_101 {dimension_numbers = #tpu.dot_dimension_numbers<[1], [0], [0], [1], [0, 0, 1, 1], [], []>} : vector<2x32xf32>, vector<32x1xf32>, vector<2x1xf32> -> vector<2x1xf32>
    %c205 = arith.constant 205 : index
    %c0_102 = arith.constant 0 : index
    %281 = vector.load %arg6[%c205, %c0_102] : memref<207x128xf32, #tpu.memory_space<vmem>>, vector<1x1xf32>
    %282 = vector.broadcast %281 : vector<1x1xf32> to vector<2x1xf32>
    %283 = arith.addf %280, %282 : vector<2x1xf32>
    %c0_103 = arith.constant 0 : index
    %c0_104 = arith.constant 0 : index
    %284 = vector.load %arg7[%c0_103, %c0_104] : memref<2x1xf32, #tpu.memory_space<vmem>>, vector<2x1xf32>
    tpu.vector_store %arg7[%c0_103, %c0_104], %283 {strides = array<i32>} : memref<2x1xf32, #tpu.memory_space<vmem>>, vector<2x1xf32>,
    return
  }
}

</mosaic_0001>

<bundles_post_ra>
// kernel: forward.1
= control target key start
LH: loop header
LB: loop body
LE: loop exit
PB: predicated region body
PF: predicated region fallthrough
CT: control target
= control target key end

     0   :  { %12 = vsyncpa [#allocation3], 0  ;;  %s3842_s24 = smov [#allocation2]   ;;  %s4893_s0 = inlined_call_operand.vmem [shape: f32[40,16], index: 0, kind: input, shape index: {}]   ;;  %s4894_s1 = inlined_call_operand.vmem [shape: f32[40,40], index: 1, kind: input, shape index: {}]   ;;  %s4895_s2 = inlined_call_operand.vmem [shape: f32[40,4], index: 2, kind: input, shape index: {}]   ;;  %s4896_s3 = inlined_call_operand.vmem [shape: f32[4,40], index: 3, kind: input, shape index: {}]   ;;  %s4897_s4 = inlined_call_operand.vmem [shape: f32[20,100], index: 4, kind: input, shape index: {}]   ;;  %s4898_s5 = inlined_call_operand.vmem [shape: f32[155,512], index: 5, kind: input, shape index: {}]   ;;  %s4899_s6 = inlined_call_operand.hbm [shape: f32[207,128], index: 6, kind: input, shape index: {}]   ;;  %s4900_s7 = inlined_call_operand.vmem [shape: f32[2,1], index: 7, kind: output, shape index: {}]  }
   0x1   :  { %s30_s25 = sshll.u32 %s3842_s24, 4  ;;  %s31_s25 = int_to_ptr.vmem [resolvable:$true] %s30_s25 }
   0x2   :  { %s3828_s26 = scalar_lea.vmem %s31_s25, 3328  ;;  %p3833_p1 = scmp.lt.s32.totalorder %s31_s25, %s31_s25 }
   0x3   :  { %p3829_p0 = scmp.ne.s32.totalorder %s31_s25, %s3828_s26  ;;  %p3834_p2 = scmp.lt.s32.totalorder %s3828_s26, %s3828_s26 }
   0x5   :  { %p3835_p3 = por %p3834_p2, %p3833_p1 }
   0x7   :  { %p3836_p4 = pnand %p3835_p3, %p3829_p0 }
   0x9   :  { %3839 = shalt.err (!%p3836_p4)
}
   0xa   :  { %s3843_s27 = smov 128   ;;  %s3844_s28 = smov 8  }
   0xb   :  { %36 = dma.hbm_to_vmem [thread:$0]  %s4899_s6, 3328, %s31_s25, [#allocation3], %s3843_s27, %s3843_s27, %s3844_s28  }
   0xc   :  { %3840 = dma.done.wait [#allocation3], 3328  }
   0xd   :  { %3841 = vsyncadd [#allocation3], 4294963968  ;;  %v3845_v0 = vmov 0.0   ;;  %vm3846_vm0 = vmmov 0   ;;  %v178_v1 = vld [vmem:[#allocation2 + $0x8] sm:$0xff]  ;;  %v177_v2 = vld [vmem:[#allocation2] sm:$0xff] }
   0xe   :  { %3399 = vmatprep.subr.mxu1 %v3845_v0  ;;  %3403 = vmatprep.mubr.msk.f32.mxu1 %vm3846_vm0, %v3845_v0  ;;  %v40_v3 = vld [vmem:[%s4893_s0] sm:$0xff]  ;;  %vm71_vm1 = vcmask 130048   ;;  %v41_v4 = vld [vmem:[%s4893_s0 + $0x8] sm:$0xff]  ;;  %v42_v5 = vld [vmem:[%s4893_s0 + $0x10] sm:$0xff]  ;;  %vm289_vm2 = vcmask 261120   ;;  %vm410_vm4 = vcmask 326656  }
   0xf   :  { %3380 = vmatprep.subr.mxu0 %v3845_v0  ;;  %3384 = vmatprep.mubr.msk.f32.mxu0 %vm3846_vm0, %v3845_v0  ;;  %v43_v6 = vld [vmem:[%s4893_s0 + $0x18] sm:$0xff]  ;;  %v44_v7 = vld [vmem:[%s4893_s0 + $0x20] sm:$0xff]  ;;  %v64_v10 = vld [vmem:[#allocation2 + $0x10] sm:$0xff]  ;;  %s3847_s0 = smov 96   ;;  %s3849_s27 = smov 32   ;;  %vm870_vm14 = vcmask 64512  }
  0x10   :  { %3400 = vmatpush3.msra.mxu1 %v178_v1  ;;  %v65_v8 = vld [vmem:[#allocation2 + $0x18] sm:$0xff]  ;;  %v3164_v14 = vld [vmem:[#allocation2 + $0xc8] ss:$0 sm:$0xff]  ;;  %v4008_v41 = vld [vmem:[%s4894_s1] sm:$0xff] }
  0x11   :  { %3401 = vmatprep.subr.mxu1 %v3845_v0  ;;  %3381 = vmatpush3.msra.mxu0 %v65_v8  ;;  %vm50_vm3 = vcmp.gt.f32.partialorder %v4008_v41, 0.0  ;;  %v4014_v44 = vld [vmem:[%s4894_s1 + $0x8] sm:$0xff]  ;;  %v4023_v50 = vld [vmem:[%s4894_s1 + $0x10] sm:$0xff]  ;;  %v4032_v56 = vld [vmem:[%s4894_s1 + $0x18] sm:$0xff] }
  0x12   :  { %3402 = vmatpush3.msra.mxu1 %v177_v2  ;;  %3382 = vmatprep.subr.mxu0 %v3845_v0  ;;  %vm51_vm5 = vcmp.gt.f32.partialorder %v4014_v44, 0.0  ;;  %vm52_vm6 = vcmp.gt.f32.partialorder %v4023_v50, 0.0  ;;  %vm53_vm7 = vcmp.gt.f32.partialorder %v4032_v56, 0.0  ;;  %v4041_v62 = vld [vmem:[%s4894_s1 + $0x20] sm:$0xff]  ;;  %s3848_s1 = smov 64   ;;  %v4285_v50 = vld [vmem:[%s4898_s5 + $0x248] sm:$0xff] }
  0x13   :  { %3404 = vmatmul.mubr.msk.f32.vlgmr.msra.gmra.mxu1 %vm71_vm1, %v40_v3  ;;  %3443 = vmatprep.subr.mxu1 %v3845_v0  ;;  %vm54_vm8 = vcmp.gt.f32.partialorder %v4041_v62, 0.0  ;;  %v4291_v56 = vld [vmem:[%s4898_s5 + $0x240] sm:$0xff]  ;;  %v4298_v62 = vld [vmem:[%s4898_s5 + $0x228] sm:$0xff] }
  0x14   :  { %3406 = vmatprep.mubr.msk.f32.mxu1 %vm3846_vm0, %v3845_v0  ;;  %3383 = vmatpush3.msra.mxu0 %v64_v10 }
  0x15   :  { %3385 = vmatmul.mubr.msk.f32.vlgmr.msra.gmra.mxu0 %vm71_vm1, %v40_v3  ;;  %3418 = vmatprep.subr.mxu0 %v3845_v0 }
  0x16   :  { %3387 = vmatprep.mubr.msk.f32.mxu0 %vm3846_vm0, %v3845_v0 }
  0x17   :  { %3407 = vmatmul.mubr.msk.f32.gmra.mxu1 %vm71_vm1, %v41_v4 }
  0x18   :  { %3409 = vmatprep.mubr.msk.f32.mxu1 %vm3846_vm0, %v3845_v0 }
  0x19   :  { %3388 = vmatmul.mubr.msk.f32.gmra.mxu0 %vm71_vm1, %v41_v4 }
  0x1a   :  { %3390 = vmatprep.mubr.msk.f32.mxu0 %vm3846_vm0, %v3845_v0 }
  0x1b   :  { %3410 = vmatmul.mubr.msk.f32.gmra.mxu1 %vm71_vm1, %v42_v5 }
  0x1c   :  { %3412 = vmatprep.mubr.msk.f32.mxu1 %vm3846_vm0, %v3845_v0 }
  0x1d   :  { %3391 = vmatmul.mubr.msk.f32.gmra.mxu0 %vm71_vm1, %v42_v5 }
  0x1e   :  { %3393 = vmatprep.mubr.msk.f32.mxu0 %vm3846_vm0, %v3845_v0 }
  0x1f   :  { %3413 = vmatmul.mubr.msk.f32.gmra.mxu1 %vm71_vm1, %v43_v6 }
  0x20   :  { %3415 = vmatprep.mubr.msk.f32.mxu1 %vm3846_vm0, %v3845_v0 }
  0x21   :  { %3394 = vmatmul.mubr.msk.f32.gmra.mxu0 %vm71_vm1, %v43_v6 }
  0x22   :  { %3396 = vmatprep.mubr.msk.f32.mxu0 %vm3846_vm0, %v3845_v0 }
  0x23   :  { %3416 = vmatmul.mubr.msk.f32.gmra.mxu1 %vm71_vm1, %v44_v7 }
  0x24   :  { %3453 = vmatprep.mubr.msk.f32.mxu1 %vm3846_vm0, %v3845_v0 }
  0x25   :  { %3397 = vmatmul.mubr.msk.f32.gmra.mxu0 %vm71_vm1, %v44_v7 }
  0x26   :  { %3428 = vmatprep.mubr.msk.f32.mxu0 %vm3846_vm0, %v3845_v0 }
  0xd3   :  { %v250_v9 = vpop.f32.mrf.mxu1 }
  0xd4   :  { %v3964_v25 = vadd.f32 %v3164_v14, %v250_v9 }
  0xd5   :  { %v3405_v11 = vpop.f32.mrf.mxu1  ;;  %v3995_v31 = vpop.f32.mrf.mxu0 }
  0xd7   :  { %v255_v12 = vpop.f32.mrf.mxu1  ;;  %v3386_v32 = vpop.f32.mrf.mxu0 }
  0xd8   :  { %v3949_v19 = vadd.f32 %v3164_v14, %v255_v12 }
  0xd9   :  { %v3408_v13 = vpop.f32.mrf.mxu1  ;;  %v3997_v33 = vpop.f32.mrf.mxu0 }
  0xdb   :  { %v260_v15 = vpop.f32.mrf.mxu1  ;;  %v3389_v34 = vpop.f32.mrf.mxu0 }
  0xdc   :  { %v3943_v16 = vadd.f32 %v3164_v14, %v260_v15 }
  0xdd   :  { %v3411_v17 = vpop.f32.mrf.mxu1  ;;  %v3999_v35 = vpop.f32.mrf.mxu0 }
  0xde   :  { %283 = vrot.lane.b32.xlu1 %v3943_v16, %s3847_s0 }
  0xdf   :  { %v265_v18 = vpop.f32.mrf.mxu1  ;;  %v3392_v36 = vpop.f32.mrf.mxu0 }
  0xe0   :  { %v3961_v24 = vadd.f32 %v3164_v14, %v265_v18 }
  0xe1   :  { %v3414_v20 = vpop.f32.mrf.mxu1  ;;  %v4001_v37 = vpop.f32.mrf.mxu0 }
  0xe2   :  { %281 = vrot.lane.b32.xlu1 %v3949_v19, %s3847_s0 }
  0xe3   :  { %v270_v21 = vpop.f32.mrf.mxu1  ;;  %v3395_v38 = vpop.f32.mrf.mxu0 }
  0xe4   :  { %v3955_v22 = vadd.f32 %v3164_v14, %v270_v21 }
  0xe5   :  { %v3417_v23 = vpop.f32.mrf.mxu1  ;;  %v4003_v39 = vpop.f32.mrf.mxu0 }
  0xe6   :  { %287 = vrot.lane.b32.xlu0 %v3955_v22, %s3847_s0 }
  0xe7   :  { %v3398_v40 = vpop.f32.mrf.mxu0 }
  0xea   :  { %285 = vrot.lane.b32.xlu0 %v3961_v24, %s3847_s0 }
  0xee   :  { %279 = vrot.lane.b32.xlu0 %v3964_v25, %s3847_s0 }
 0x150   :  { %v284_v28 = vpop.permute.xlu1 %283 }
 0x154   :  { %v282_v29 = vpop.permute.xlu1 %281 }
 0x158   :  { %v288_v26 = vpop.permute.xlu0 %287 }
 0x159   :  { %3419 = vmatpush3.xpose.msk.msra.mxu0 %vm289_vm2, %v288_v26 }
 0x15a   :  { %3420 = vmatprep.subr.mxu0 %v3845_v0 }
 0x15c   :  { %v286_v27 = vpop.permute.xlu0 %285 }
 0x15d   :  { %3421 = vmatpush3.xpose.msk.msra.mxu0 %vm289_vm2, %v286_v27 }
 0x15e   :  { %3422 = vmatprep.subr.mxu0 %v3845_v0 }
 0x160   :  { %v280_v30 = vpop.permute.xlu0 %279 }
 0x161   :  { %3423 = vmatpush3.xpose.msk.msra.mxu0 %vm289_vm2, %v284_v28 }
 0x162   :  { %3424 = vmatprep.subr.mxu0 %v3845_v0 }
 0x165   :  { %3425 = vmatpush3.xpose.msk.msra.mxu0 %vm289_vm2, %v282_v29 }
 0x166   :  { %3426 = vmatprep.subr.mxu0 %v3845_v0 }
 0x169   :  { %3427 = vmatpush3.xpose.msk.msra.mxu0 %vm289_vm2, %v280_v30 }
 0x16c   :  { %3429 = vmatmul.mubr.msk.f32.vlgmr.msra.gmra.mxu0 %vm289_vm2, %v3964_v25 }
 0x16d   :  { %3431 = vmatprep.mubr.msk.f32.mxu0 %vm3846_vm0, %v3845_v0 }
 0x170   :  { %3432 = vmatmul.mubr.msk.f32.gmra.mxu0 %vm289_vm2, %v3949_v19 }
 0x171   :  { %3434 = vmatprep.mubr.msk.f32.mxu0 %vm3846_vm0, %v3845_v0 }
 0x174   :  { %3435 = vmatmul.mubr.msk.f32.gmra.mxu0 %vm289_vm2, %v3943_v16 }
 0x175   :  { %3437 = vmatprep.mubr.msk.f32.mxu0 %vm3846_vm0, %v3845_v0 }
 0x178   :  { %3438 = vmatmul.mubr.msk.f32.gmra.mxu0 %vm289_vm2, %v3961_v24 }
 0x179   :  { %3440 = vmatprep.mubr.msk.f32.mxu0 %vm3846_vm0, %v3845_v0 }
 0x17c   :  { %3441 = vmatmul.mubr.msk.f32.gmra.mxu0 %vm289_vm2, %v3955_v22 }
 0x17d   :  { %744 = vmatprep.mubr.f32.mxu0 %v3845_v0 }
 0x22c   :  { %v376_v42 = vpop.f32.mrf.mxu0 }
 0x22d   :  { %v400_v43 = vmul.f32 0.17677669, %v376_v42 }
 0x22e   :  { %v3430_v45 = vpop.f32.mrf.mxu0 }
 0x22f   :  { %v405_v46 = vsel %vm50_vm3, %v400_v43, -1e+30 }
 0x230   :  { %v381_v47 = vpop.f32.mrf.mxu0  ;;  %v411_v48 = vsel %vm410_vm4, %v405_v46, -inf }
 0x231   :  { %v401_v49 = vmul.f32 0.17677669, %v381_v47  ;;  %412 = vmax.xlane.f32.xlu1 %v411_v48 }
 0x232   :  { %v3433_v51 = vpop.f32.mrf.mxu0 }
 0x233   :  { %v406_v52 = vsel %vm51_vm5, %v401_v49, -1e+30 }
 0x234   :  { %v386_v53 = vpop.f32.mrf.mxu0  ;;  %v414_v54 = vsel %vm410_vm4, %v406_v52, -inf }
 0x235   :  { %v402_v55 = vmul.f32 0.17677669, %v386_v53  ;;  %415 = vmax.xlane.f32.xlu0 %v414_v54 }
 0x236   :  { %v3436_v57 = vpop.f32.mrf.mxu0 }
 0x237   :  { %v407_v58 = vsel %vm52_vm6, %v402_v55, -1e+30 }
 0x238   :  { %v391_v59 = vpop.f32.mrf.mxu0  ;;  %v417_v60 = vsel %vm410_vm4, %v407_v58, -inf }
 0x239   :  { %v403_v61 = vmul.f32 0.17677669, %v391_v59  ;;  %418 = vmax.xlane.f32.xlu0 %v417_v60  ;;  %v639_v60 = vld [vmem:[%s4898_s5 + $0x208] sm:$0xff] }
 0x23a   :  { %v3439_v63 = vpop.f32.mrf.mxu0  ;;  %704 = vmatprep.subr.mxu0 %v639_v60 }
 0x23b   :  { %v408_v1 = vsel %vm53_vm7, %v403_v61, -1e+30 }
 0x23c   :  { %v396_v2 = vpop.f32.mrf.mxu0  ;;  %v420_v3 = vsel %vm410_vm4, %v408_v1, -inf }
 0x23d   :  { %v404_v4 = vmul.f32 0.17677669, %v396_v2  ;;  %421 = vmax.xlane.f32.xlu1 %v420_v3 }
 0x23e   :  { %v3442_v5 = vpop.f32.mrf.mxu0 }
 0x23f   :  { %v409_v6 = vsel %vm54_vm8, %v404_v4, -1e+30 }
 0x240   :  { %v423_v7 = vsel %vm410_vm4, %v409_v6, -inf }
 0x241   :  { %424 = vmax.xlane.f32.xlu0 %v423_v7 }
 0x24e   :  { %492 = vrot.lane.b32.xlu1 %v3961_v24, %s3848_s1 }
 0x252   :  { %490 = vrot.lane.b32.xlu1 %v3943_v16, %s3848_s1 }
 0x257   :  { %494 = vrot.lane.b32.xlu0 %v3955_v22, %s3848_s1 }
 0x2ba   :  { %v413_v8 = vpop.xlane.xlu1 %412 }
 0x2bb   :  { %v426_v9 = vsub.f32 %v400_v43, %v413_v8 }
 0x2bd   :  { %v431_v10 = vmin.f32 %v426_v9, 0.0 }
 0x2be   :  { %v416_v11 = vpop.xlane.xlu0 %415 }
 0x2bf   :  { %v436_v12 = vmul.f32 1.442695, %v431_v10  ;;  %v427_v13 = vsub.f32 %v401_v49, %v416_v11  ;;  %v641_v11 = vld [vmem:[%s4898_s5 + $0x218] sm:$0xff] }
 0x2c1   :  { %3678 = vpow2.f32 %v436_v12  ;;  %v432_v14 = vmin.f32 %v427_v13, 0.0 }
 0x2c2   :  { %v419_v15 = vpop.xlane.xlu0 %418 }
 0x2c3   :  { %v438_v17 = vmul.f32 1.442695, %v432_v14  ;;  %v428_v18 = vsub.f32 %v402_v55, %v419_v15  ;;  %v640_v14 = vld [vmem:[%s4898_s5 + $0x210] sm:$0xff] }
 0x2c5   :  { %3680 = vpow2.f32 %v438_v17  ;;  %v433_v20 = vmin.f32 %v428_v18, 0.0  ;;  %v637_v17 = vld [vmem:[%s4898_s5 + $0x1f8] sm:$0xff] }
 0x2c6   :  { %v422_v21 = vpop.xlane.xlu1 %421 }
 0x2c7   :  { %v440_v23 = vmul.f32 1.442695, %v433_v20  ;;  %v429_v26 = vsub.f32 %v403_v61, %v422_v21 }
 0x2c9   :  { %3682 = vpow2.f32 %v440_v23  ;;  %v434_v27 = vmin.f32 %v429_v26, 0.0 }
 0x2ca   :  { %v425_v28 = vpop.xlane.xlu0 %424  ;;  %v493_v32 = vpop.permute.xlu1 %492 }
 0x2cb   :  { %v442_v29 = vmul.f32 1.442695, %v434_v27  ;;  %v430_v30 = vsub.f32 %v404_v4, %v425_v28 }
 0x2cd   :  { %3684 = vpow2.f32 %v442_v29  ;;  %v435_v34 = vmin.f32 %v430_v30, 0.0  ;;  %v636_v29 = vld [vmem:[%s4898_s5 + $0x1f0] sm:$0xff]  ;;  %v633_v30 = vld [vmem:[%s4898_s5 + $0x1d8] sm:$0xff] }
 0x2ce   :  { %v3679_v36 = vpop.eup %3678  ;;  %v495_v38 = vpop.permute.xlu0 %494 }
 0x2cf   :  { %v444_v40 = vmul.f32 1.442695, %v435_v34  ;;  %3444 = vmatpush3.msra.mxu1 %v495_v38  ;;  %v4058_v42 = vsel %vm50_vm3, %v3679_v36, 0.0  ;;  %v491_v46 = vpop.permute.xlu1 %490  ;;  %v627_v34 = vld [vmem:[%s4898_s5 + $0x1a8] sm:$0xff]  ;;  %v629_v36 = vld [vmem:[%s4898_s5 + $0x1b8] sm:$0xff]  ;;  %v626_v38 = vld [vmem:[%s4898_s5 + $0x1a0] sm:$0xff] }
 0x2d0   :  { %3445 = vmatprep.subr.mxu1 %v3845_v0  ;;  %v451_v43 = vsel %vm410_vm4, %v4058_v42, 0.0 }
 0x2d1   :  { %3686 = vpow2.f32 %v444_v40  ;;  %452 = vadd.xlane.f32.xlu1 %v451_v43  ;;  %3446 = vmatpush3.msra.mxu1 %v493_v32  ;;  %v632_v32 = vld [vmem:[%s4898_s5 + $0x1d0] sm:$0xff] }
 0x2d2   :  { %v3681_v45 = vpop.eup %3680  ;;  %3447 = vmatprep.subr.mxu1 %v3845_v0  ;;  %v628_v40 = vld [vmem:[%s4898_s5 + $0x1b0] sm:$0xff] }
 0x2d3   :  { %3448 = vmatpush3.msra.mxu1 %v491_v46  ;;  %v4066_v47 = vsel %vm51_vm5, %v3681_v45, 0.0 }
 0x2d4   :  { %v454_v48 = vsel %vm410_vm4, %v4066_v47, 0.0  ;;  %3449 = vmatprep.subr.mxu1 %v3845_v0 }
 0x2d5   :  { %455 = vadd.xlane.f32.xlu0 %v454_v48 }
 0x2d6   :  { %v3683_v49 = vpop.eup %3682 }
 0x2d7   :  { %v4073_v51 = vsel %vm52_vm6, %v3683_v49, 0.0 }
 0x2d8   :  { %v457_v52 = vsel %vm410_vm4, %v4073_v51, 0.0 }
 0x2d9   :  { %458 = vadd.xlane.f32.xlu1 %v457_v52 }
 0x2da   :  { %v3685_v53 = vpop.eup %3684 }
 0x2db   :  { %v4079_v54 = vsel %vm53_vm7, %v3685_v53, 0.0 }
 0x2dc   :  { %v460_v55 = vsel %vm410_vm4, %v4079_v54, 0.0 }
 0x2dd   :  { %461 = vadd.xlane.f32.xlu0 %v460_v55 }
 0x2de   :  { %v3687_v57 = vpop.eup %3686 }
 0x2df   :  { %v4085_v58 = vsel %vm54_vm8, %v3687_v57, 0.0 }
 0x2e0   :  { %v463_v59 = vsel %vm410_vm4, %v4085_v58, 0.0 }
 0x2e1   :  { %464 = vadd.xlane.f32.xlu1 %v463_v59 }
 0x2f2   :  { %486 = vrot.lane.b32.xlu1 %v3964_v25, %s3848_s1 }
 0x2f3   :  { %488 = vrot.lane.b32.xlu0 %v3949_v19, %s3848_s1 }
 0x2f6   :  { %503 = vrot.lane.b32.xlu1 %v3949_v19, %s3849_s27  ;;  %v638_v19 = vld [vmem:[%s4898_s5 + $0x200] sm:$0xff] }
 0x2f7   :  { %501 = vrot.lane.b32.xlu0 %v3964_v25, %s3849_s27  ;;  %v635_v25 = vld [vmem:[%s4898_s5 + $0x1e8] sm:$0xff]  ;;  %705 = vmatpush1.msra.mxu0 %v638_v19 }
 0x2f8   :  { %706 = vmatprep.subr.mxu0 %v635_v25 }
 0x2fa   :  { %507 = vrot.lane.b32.xlu1 %v3961_v24, %s3849_s27  ;;  %v630_v24 = vld [vmem:[%s4898_s5 + $0x1c0] sm:$0xff] }
 0x2fb   :  { %505 = vrot.lane.b32.xlu0 %v3943_v16, %s3849_s27  ;;  %v634_v16 = vld [vmem:[%s4898_s5 + $0x1e0] sm:$0xff] }
 0x2fc   :  { %707 = vmatpush1.msra.mxu0 %v634_v16 }
 0x2ff   :  { %509 = vrot.lane.b32.xlu0 %v3955_v22, %s3849_s27  ;;  %v631_v22 = vld [vmem:[%s4898_s5 + $0x1c8] sm:$0xff] }
 0x300   :  { %708 = vmatprep.subr.mxu0 %v631_v22 }
 0x301   :  { %709 = vmatpush1.msra.mxu0 %v630_v24 }
 0x302   :  { %710 = vmatprep.subr.mxu0 %v627_v34 }
 0x303   :  { %711 = vmatpush1.msra.mxu0 %v626_v38 }
 0x304   :  { %3468 = vmatprep.subr.mxu0 %v3845_v0 }
 0x35a   :  { %v453_v61 = vpop.xlane.xlu1 %452 }
 0x35b   :  { %vm466_vm9 = vcmp.gt.f32.partialorder %v453_v61, 0.0 }
 0x35c   :  { %v471_v63 = vsel %vm466_vm9, %v453_v61, 1.0  ;;  %vm1532_vm9 = vcmask 31744  }
 0x35d   :  { %3688 = vrcp.f32 %v471_v63 }
 0x35e   :  { %v456_v1 = vpop.xlane.xlu0 %455 }
 0x35f   :  { %vm467_vm10 = vcmp.gt.f32.partialorder %v456_v1, 0.0 }
 0x360   :  { %v472_v2 = vsel %vm467_vm10, %v456_v1, 1.0 }
 0x361   :  { %3690 = vrcp.f32 %v472_v2 }
 0x362   :  { %v459_v3 = vpop.xlane.xlu1 %458 }
 0x363   :  { %vm468_vm11 = vcmp.gt.f32.partialorder %v459_v3, 0.0 }
 0x364   :  { %v473_v4 = vsel %vm468_vm11, %v459_v3, 1.0 }
 0x365   :  { %3692 = vrcp.f32 %v473_v4 }
 0x366   :  { %v462_v5 = vpop.xlane.xlu0 %461 }
 0x367   :  { %vm469_vm12 = vcmp.gt.f32.partialorder %v462_v5, 0.0 }
 0x368   :  { %v474_v6 = vsel %vm469_vm12, %v462_v5, 1.0 }
 0x369   :  { %3694 = vrcp.f32 %v474_v6 }
 0x36a   :  { %v465_v7 = vpop.xlane.xlu1 %464  ;;  %v489_v8 = vpop.permute.xlu0 %488 }
 0x36b   :  { %v3689_v9 = vpop.eup %3688  ;;  %vm470_vm13 = vcmp.gt.f32.partialorder %v465_v7, 0.0  ;;  %3450 = vmatpush3.msra.mxu1 %v489_v8 }
 0x36c   :  { %v475_v10 = vsel %vm470_vm13, %v465_v7, 1.0  ;;  %3451 = vmatprep.subr.mxu1 %v3845_v0  ;;  %v481_v12 = vmul.f32 %v3689_v9, %v4058_v42  ;;  %v645_v7 = vlaneseq }
 0x36d   :  { %3696 = vrcp.f32 %v475_v10 }
 0x36e   :  { %v487_v13 = vpop.permute.xlu1 %486  ;;  %v3691_v15 = vpop.eup %3690 }
 0x36f   :  { %3452 = vmatpush3.msra.mxu1 %v487_v13  ;;  %v482_v18 = vmul.f32 %v3691_v15, %v4066_v47  ;;  %v502_v42 = vpop.permute.xlu0 %501 }
 0x370   :  { %3454 = vmatmul.mubr.msk.f32.vlgmr.msra.gmra.mxu1 %vm410_vm4, %v481_v12  ;;  %799 = vmatprep.subr.mxu1 %v641_v11  ;;  %v4199_v12 = vshrl.u32 %v645_v7, 7 }
 0x371   :  { %3456 = vmatprep.mubr.msk.f32.mxu1 %vm3846_vm0, %v3845_v0  ;;  %800 = vmatpush1.msra.mxu1 %v640_v14 }
 0x372   :  { %801 = vmatprep.subr.mxu1 %v637_v17  ;;  %v3693_v20 = vpop.eup %3692  ;;  %v504_v48 = vpop.permute.xlu1 %503 }
 0x373   :  { %v483_v21 = vmul.f32 %v3693_v20, %v4073_v51  ;;  %802 = vmatpush1.msra.mxu1 %v636_v29  ;;  %v4209_v20 = vld [vmem:[%s4898_s5 + $0x261] ss:$8 sm:$0xf] }
 0x374   :  { %3457 = vmatmul.mubr.msk.f32.gmra.mxu1 %vm410_vm4, %v482_v18  ;;  %803 = vmatprep.subr.mxu1 %v633_v30  ;;  %v4204_v18 = vsub.s32 2, %v4199_v12 }
 0x375   :  { %3459 = vmatprep.mubr.msk.f32.mxu1 %vm3846_vm0, %v3845_v0  ;;  %804 = vmatpush1.msra.mxu1 %v632_v32 }
 0x376   :  { %v3695_v23 = vpop.eup %3694  ;;  %805 = vmatprep.subr.mxu1 %v629_v36  ;;  %v508_v60 = vpop.permute.xlu1 %507  ;;  %v656_v29 = vrot.slane %v4209_v20, %v4204_v18 }
 0x377   :  { %v484_v26 = vmul.f32 %v3695_v23, %v4079_v54  ;;  %806 = vmatpush1.msra.mxu1 %v628_v40  ;;  %v506_v54 = vpop.permute.xlu0 %505 }
 0x378   :  { %3460 = vmatmul.mubr.msk.f32.gmra.mxu1 %vm410_vm4, %v483_v21  ;;  %3493 = vmatprep.subr.mxu1 %v3845_v0 }
 0x379   :  { %3462 = vmatprep.mubr.msk.f32.mxu1 %vm3846_vm0, %v3845_v0 }
 0x37a   :  { %v3697_v27 = vpop.eup %3696 }
 0x37b   :  { %v485_v28 = vmul.f32 %v3697_v27, %v4085_v58  ;;  %v510_v24 = vpop.permute.xlu0 %509 }
 0x37c   :  { %3463 = vmatmul.mubr.msk.f32.gmra.mxu1 %vm410_vm4, %v484_v26  ;;  %v4212_v26 = vsub.s32 1, %v4199_v12 }
 0x37d   :  { %3465 = vmatprep.mubr.msk.f32.mxu1 %vm3846_vm0, %v3845_v0 }
 0x37e   :  { %v652_v34 = vrot.slane %v4209_v20, %v4212_v26 }
 0x380   :  { %3466 = vmatmul.mubr.msk.f32.gmra.mxu1 %vm410_vm4, %v485_v28 }
 0x381   :  { %839 = vmatprep.mubr.f32.mxu1 %v3845_v0 }
 0x430   :  { %v597_v43 = vpop.f32.mrf.mxu1 }
 0x431   :  { %v598_v45 = vadd.f32 %v597_v43, %v502_v42 }
 0x432   :  { %v3455_v46 = vpop.f32.mrf.mxu1 }
 0x433   :  { %v621_v47 = vmax.f32 %v598_v45, 0.0 }
 0x434   :  { %v602_v49 = vpop.f32.mrf.mxu1 }
 0x435   :  { %v603_v51 = vadd.f32 %v602_v49, %v504_v48  ;;  %3186 = vmatmul.mubr.msk.f32.vlgmr.msra.gmra.mxu0 %vm289_vm2, %v621_v47  ;;  %3191 = vmatmul.mubr.msk.f32.vlgmr.msra.gmra.mxu1 %vm289_vm2, %v621_v47  ;;  %v4230_v49 = vsub.s32 0, %v4199_v12 }
 0x436   :  { %v3458_v52 = vpop.f32.mrf.mxu1  ;;  %750 = vmatprep.mubr.f32.mxu0 %v3845_v0  ;;  %845 = vmatprep.mubr.f32.mxu1 %v3845_v0 }
 0x437   :  { %v622_v53 = vmax.f32 %v603_v51, 0.0  ;;  %v648_v52 = vrot.slane %v4209_v20, %v4230_v49 }
 0x438   :  { %v607_v55 = vpop.f32.mrf.mxu1 }
 0x439   :  { %v608_v57 = vadd.f32 %v607_v55, %v506_v54  ;;  %3187 = vmatmul.mubr.msk.f32.gmra.mxu0 %vm289_vm2, %v622_v53  ;;  %3192 = vmatmul.mubr.msk.f32.gmra.mxu1 %vm289_vm2, %v622_v53 }
 0x43a   :  { %v3461_v58 = vpop.f32.mrf.mxu1  ;;  %756 = vmatprep.mubr.f32.mxu0 %v3845_v0  ;;  %851 = vmatprep.mubr.f32.mxu1 %v3845_v0 }
 0x43b   :  { %v623_v59 = vmax.f32 %v608_v57, 0.0 }
 0x43c   :  { %v612_v19 = vpop.f32.mrf.mxu1 }
 0x43d   :  { %v613_v25 = vadd.f32 %v612_v19, %v508_v60  ;;  %3188 = vmatmul.mubr.msk.f32.gmra.mxu0 %vm289_vm2, %v623_v59  ;;  %3193 = vmatmul.mubr.msk.f32.gmra.mxu1 %vm289_vm2, %v623_v59 }
 0x43e   :  { %v3464_v16 = vpop.f32.mrf.mxu1  ;;  %762 = vmatprep.mubr.f32.mxu0 %v3845_v0  ;;  %857 = vmatprep.mubr.f32.mxu1 %v3845_v0 }
 0x43f   :  { %v624_v22 = vmax.f32 %v613_v25, 0.0 }
 0x440   :  { %v617_v61 = vpop.f32.mrf.mxu1 }
 0x441   :  { %v618_v63 = vadd.f32 %v617_v61, %v510_v24  ;;  %3189 = vmatmul.mubr.msk.f32.gmra.mxu0 %vm289_vm2, %v624_v22  ;;  %3194 = vmatmul.mubr.msk.f32.gmra.mxu1 %vm289_vm2, %v624_v22 }
 0x442   :  { %v3467_v1 = vpop.f32.mrf.mxu1  ;;  %768 = vmatprep.mubr.f32.mxu0 %v3845_v0  ;;  %863 = vmatprep.mubr.f32.mxu1 %v3845_v0 }
 0x443   :  { %v625_v2 = vmax.f32 %v618_v63, 0.0 }
 0x445   :  { %3190 = vmatmul.mubr.msk.f32.gmra.mxu0 %vm289_vm2, %v625_v2  ;;  %3195 = vmatmul.mubr.msk.f32.gmra.mxu1 %vm289_vm2, %v625_v2 }
 0x446   :  { %3478 = vmatprep.mubr.msk.f32.mxu0 %vm3846_vm0, %v3845_v0  ;;  %3503 = vmatprep.mubr.msk.f32.mxu1 %vm3846_vm0, %v3845_v0 }
 0x4f5   :  { %v746_v3 = vpop.f32.mrf.mxu0  ;;  %v841_v4 = vpop.f32.mrf.mxu1 }
 0x4f6   :  { %v842_v47 = vadd.f32 %v841_v4, %v656_v29  ;;  %v747_v54 = vadd.f32 %v746_v3, %v648_v52 }
 0x4f7   :  { %v748_v5 = vpop.f32.mrf.mxu0  ;;  %v4195_v6 = vpop.f32.mrf.mxu1 }
 0x4f8   :  { %v749_v53 = vadd.f32 %v748_v5, %v652_v34 }
 0x4f9   :  { %v752_v8 = vpop.f32.mrf.mxu0  ;;  %v847_v9 = vpop.f32.mrf.mxu1 }
 0x4fa   :  { %v848_v45 = vadd.f32 %v847_v9, %v656_v29  ;;  %v753_v55 = vadd.f32 %v752_v8, %v648_v52 }
 0x4fb   :  { %v754_v10 = vpop.f32.mrf.mxu0  ;;  %v4197_v11 = vpop.f32.mrf.mxu1 }
 0x4fc   :  { %v755_v51 = vadd.f32 %v754_v10, %v652_v34 }
 0x4fd   :  { %v758_v13 = vpop.f32.mrf.mxu0  ;;  %v853_v14 = vpop.f32.mrf.mxu1 }
 0x4fe   :  { %v854_v43 = vadd.f32 %v853_v14, %v656_v29  ;;  %v759_v57 = vadd.f32 %v758_v13, %v648_v52 }
 0x4ff   :  { %v760_v15 = vpop.f32.mrf.mxu0  ;;  %v4201_v17 = vpop.f32.mrf.mxu1 }
 0x500   :  { %v761_v48 = vadd.f32 %v760_v15, %v652_v34 }
 0x501   :  { %v764_v21 = vpop.f32.mrf.mxu0  ;;  %v859_v23 = vpop.f32.mrf.mxu1 }
 0x502   :  { %v860_v40 = vadd.f32 %v859_v23, %v656_v29  ;;  %v765_v58 = vadd.f32 %v764_v21, %v648_v52 }
 0x503   :  { %v766_v27 = vpop.f32.mrf.mxu0  ;;  %v4214_v28 = vpop.f32.mrf.mxu1 }
 0x504   :  { %v767_v46 = vadd.f32 %v766_v27, %v652_v34 }
 0x505   :  { %v770_v30 = vpop.f32.mrf.mxu0  ;;  %v865_v32 = vpop.f32.mrf.mxu1 }
 0x506   :  { %v866_v36 = vadd.f32 %v865_v32, %v656_v29  ;;  %v771_v59 = vadd.f32 %v770_v30, %v648_v52 }
 0x507   :  { %v772_v38 = vpop.f32.mrf.mxu0 }
 0x508   :  { %v773_v42 = vadd.f32 %v772_v38, %v652_v34  ;;  %3494 = vmatpush3.msra.mxu1 %v866_v36 }
 0x509   :  { %3495 = vmatprep.subr.mxu1 %v3845_v0 }
 0x50a   :  { %3469 = vmatpush3.xpose.msk.msra.mxu0 %vm870_vm14, %v773_v42  ;;  %3496 = vmatpush3.msra.mxu1 %v860_v40 }
 0x50b   :  { %3497 = vmatprep.subr.mxu1 %v3845_v0  ;;  %3470 = vmatprep.subr.mxu0 %v3845_v0 }
 0x50c   :  { %3498 = vmatpush3.msra.mxu1 %v854_v43 }
 0x50d   :  { %3499 = vmatprep.subr.mxu1 %v3845_v0 }
 0x50e   :  { %3471 = vmatpush3.xpose.msk.msra.mxu0 %vm870_vm14, %v767_v46  ;;  %3500 = vmatpush3.msra.mxu1 %v848_v45 }
 0x50f   :  { %3501 = vmatprep.subr.mxu1 %v3845_v0  ;;  %3472 = vmatprep.subr.mxu0 %v3845_v0 }
 0x510   :  { %3502 = vmatpush3.msra.mxu1 %v842_v47 }
 0x512   :  { %3473 = vmatpush3.xpose.msk.msra.mxu0 %vm870_vm14, %v761_v48 }
 0x513   :  { %3474 = vmatprep.subr.mxu0 %v3845_v0 }
 0x516   :  { %3475 = vmatpush3.xpose.msk.msra.mxu0 %vm870_vm14, %v755_v51 }
 0x517   :  { %3476 = vmatprep.subr.mxu0 %v3845_v0 }
 0x51a   :  { %3477 = vmatpush3.xpose.msk.msra.mxu0 %vm870_vm14, %v749_v53 }
 0x51b   :  { %1229 = vmatprep.subr.mxu0 %v4285_v50 }
 0x51d   :  { %3479 = vmatmul.mubr.msk.f32.vlgmr.msra.gmra.mxu0 %vm870_vm14, %v747_v54 }
 0x51e   :  { %3481 = vmatprep.mubr.msk.f32.mxu0 %vm3846_vm0, %v3845_v0  ;;  %1230 = vmatpush1.msra.mxu0 %v4291_v56 }
 0x51f   :  { %1371 = vmatprep.subr.mxu0 %v4298_v62 }
 0x521   :  { %3482 = vmatmul.mubr.msk.f32.gmra.mxu0 %vm870_vm14, %v753_v55 }
 0x522   :  { %3484 = vmatprep.mubr.msk.f32.mxu0 %vm3846_vm0, %v3845_v0 }
 0x525   :  { %3485 = vmatmul.mubr.msk.f32.gmra.mxu0 %vm870_vm14, %v759_v57 }
 0x526   :  { %3487 = vmatprep.mubr.msk.f32.mxu0 %vm3846_vm0, %v3845_v0 }
 0x529   :  { %3488 = vmatmul.mubr.msk.f32.gmra.mxu0 %vm870_vm14, %v765_v58 }
 0x52a   :  { %3490 = vmatprep.mubr.msk.f32.mxu0 %vm3846_vm0, %v3845_v0 }
 0x52d   :  { %3491 = vmatmul.mubr.msk.f32.gmra.mxu0 %vm870_vm14, %v771_v59 }
 0x52e   :  { %1263 = vmatprep.mubr.f32.mxu0 %v3845_v0 }
 0x531   :  { %1264 = vmatmul.mubr.f32.vlgmr.msra.gmra.mxu0 %v3845_v0 }
 0x532   :  { %1405 = vmatprep.mubr.f32.mxu0 %v3845_v0 }
 0x5dd   :  { %v967_v60 = vpop.f32.mrf.mxu0 }
 0x5de   :  { %v991_v19 = vmul.f32 0.35355338, %v967_v60 }
 0x5df   :  { %v3480_v25 = vpop.f32.mrf.mxu0 }
 0x5e0   :  { %v996_v16 = vsel %vm50_vm3, %v991_v19, -1e+30 }
 0x5e1   :  { %v972_v22 = vpop.f32.mrf.mxu0  ;;  %v1001_v24 = vsel %vm410_vm4, %v996_v16, -inf }
 0x5e2   :  { %v992_v61 = vmul.f32 0.35355338, %v972_v22  ;;  %1002 = vmax.xlane.f32.xlu1 %v1001_v24 }
 0x5e3   :  { %v3483_v63 = vpop.f32.mrf.mxu0 }
 0x5e4   :  { %v997_v1 = vsel %vm51_vm5, %v992_v61, -1e+30 }
 0x5e5   :  { %v977_v2 = vpop.f32.mrf.mxu0  ;;  %v1004_v3 = vsel %vm410_vm4, %v997_v1, -inf }
 0x5e6   :  { %v993_v4 = vmul.f32 0.35355338, %v977_v2  ;;  %1005 = vmax.xlane.f32.xlu0 %v1004_v3 }
 0x5e7   :  { %v3486_v5 = vpop.f32.mrf.mxu0 }
 0x5e8   :  { %v998_v7 = vsel %vm52_vm6, %v993_v4, -1e+30 }
 0x5e9   :  { %v982_v8 = vpop.f32.mrf.mxu0  ;;  %v1007_v9 = vsel %vm410_vm4, %v998_v7, -inf }
 0x5ea   :  { %v994_v10 = vmul.f32 0.35355338, %v982_v8  ;;  %1008 = vmax.xlane.f32.xlu0 %v1007_v9  ;;  %v4305_v8 = vld [vmem:[%s4898_s5 + $0x220] sm:$0xff]  ;;  %v4312_v9 = vld [vmem:[%s4898_s5 + $0x258] sm:$0xff] }
 0x5eb   :  { %v3489_v13 = vpop.f32.mrf.mxu0  ;;  %1372 = vmatpush1.msra.mxu0 %v4305_v8  ;;  %1300 = vmatprep.subr.mxu1 %v4312_v9 }
 0x5ec   :  { %v999_v14 = vsel %vm53_vm7, %v994_v10, -1e+30  ;;  %1406 = vmatmul.mubr.f32.vlgmr.msra.gmra.mxu0 %v3845_v0  ;;  %3518 = vmatprep.subr.mxu0 %v3845_v0 }
 0x5ed   :  { %v987_v15 = vpop.f32.mrf.mxu0  ;;  %v1010_v21 = vsel %vm410_vm4, %v999_v14, -inf  ;;  %3520 = vmatprep.mubr.msk.f32.mxu0 %vm3846_vm0, %v3845_v0 }
 0x5ee   :  { %v995_v23 = vmul.f32 0.35355338, %v987_v15  ;;  %1011 = vmax.xlane.f32.xlu1 %v1010_v21 }
 0x5ef   :  { %v3492_v27 = vpop.f32.mrf.mxu0 }
 0x5f0   :  { %v1000_v29 = vsel %vm54_vm8, %v995_v23, -1e+30 }
 0x5f1   :  { %v1013_v30 = vsel %vm410_vm4, %v1000_v29, -inf }
 0x5f2   :  { %1014 = vmax.xlane.f32.xlu0 %v1013_v30 }
 0x66b   :  { %v1003_v32 = vpop.xlane.xlu1 %1002 }
 0x66c   :  { %v1016_v34 = vsub.f32 %v991_v19, %v1003_v32 }
 0x66e   :  { %v1021_v36 = vmin.f32 %v1016_v34, 0.0 }
 0x66f   :  { %v1006_v38 = vpop.xlane.xlu0 %1005 }
 0x670   :  { %v1026_v40 = vmul.f32 1.442695, %v1021_v36  ;;  %v1017_v42 = vsub.f32 %v992_v61, %v1006_v38  ;;  %v4321_v36 = vld [vmem:[%s4898_s5 + $0x250] sm:$0xff] }
 0x672   :  { %3698 = vpow2.f32 %v1026_v40  ;;  %v1022_v43 = vmin.f32 %v1017_v42, 0.0  ;;  %v4326_v40 = vld [vmem:[%s4898_s5 + $0x238] sm:$0xff] }
 0x673   :  { %v1009_v45 = vpop.xlane.xlu0 %1008 }
 0x674   :  { %v1028_v46 = vmul.f32 1.442695, %v1022_v43  ;;  %v1018_v47 = vsub.f32 %v993_v4, %v1009_v45 }
 0x676   :  { %3700 = vpow2.f32 %v1028_v46  ;;  %v1023_v48 = vmin.f32 %v1018_v47, 0.0 }
 0x677   :  { %v1012_v51 = vpop.xlane.xlu1 %1011 }
 0x678   :  { %v1030_v52 = vmul.f32 1.442695, %v1023_v48  ;;  %v1019_v53 = vsub.f32 %v994_v10, %v1012_v51 }
 0x67a   :  { %3702 = vpow2.f32 %v1030_v52  ;;  %v1024_v54 = vmin.f32 %v1019_v53, 0.0  ;;  %v4347_v53 = vld [vmem:[%s4898_s5 + $0x230] sm:$0xff] }
 0x67b   :  { %v1015_v55 = vpop.xlane.xlu0 %1014 }
 0x67c   :  { %v1032_v57 = vmul.f32 1.442695, %v1024_v54  ;;  %v1020_v58 = vsub.f32 %v995_v23, %v1015_v55  ;;  %v1265_v54 = vpop.f32.mrf.mxu0 }
 0x67e   :  { %3704 = vpow2.f32 %v1032_v57  ;;  %v1025_v59 = vmin.f32 %v1020_v58, 0.0  ;;  %v1267_v55 = vpop.f32.mrf.mxu0  ;;  %v659_v58 = vsub.s32 3, %v4199_v12 }
 0x67f   :  { %v3699_v60 = vpop.eup %3698 }
 0x680   :  { %v1034_v19 = vmul.f32 1.442695, %v1025_v59  ;;  %v1036_v25 = vsel %vm50_vm3, %v3699_v60, 0.0  ;;  %v3211_v59 = vld [vmem:[%s4898_s5 + $0x262] ss:$8 sm:$0xf] }
 0x681   :  { %v1041_v16 = vsel %vm410_vm4, %v1036_v25, 0.0 }
 0x682   :  { %3706 = vpow2.f32 %v1034_v19  ;;  %1042 = vadd.xlane.f32.xlu1 %v1041_v16  ;;  %v660_v19 = vrot.slane %v4209_v20, %v659_v58  ;;  %v4362_v16 = vrot.slane %v3211_v59, %v4212_v26 }
 0x683   :  { %v3701_v22 = vpop.eup %3700 }
 0x684   :  { %v1037_v24 = vsel %vm51_vm5, %v3701_v22, 0.0 }
 0x685   :  { %v1044_v61 = vsel %vm410_vm4, %v1037_v24, 0.0 }
 0x686   :  { %1045 = vadd.xlane.f32.xlu0 %v1044_v61  ;;  %v3158_v61 = vld [vmem:[#allocation2 + $0xc9] ss:$0 sm:$0xff] }
 0x687   :  { %v3703_v63 = vpop.eup %3702 }
 0x688   :  { %v1038_v1 = vsel %vm52_vm6, %v3703_v63, 0.0  ;;  %v867_v63 = vpop.f32.mrf.mxu1 }
 0x689   :  { %v1047_v2 = vsel %vm410_vm4, %v1038_v1, 0.0 }
 0x68a   :  { %1048 = vadd.xlane.f32.xlu1 %v1047_v2 }
 0x68b   :  { %v3705_v41 = vpop.eup %3704 }
 0x68c   :  { %v1039_v3 = vsel %vm53_vm7, %v3705_v41, 0.0 }
 0x68d   :  { %v1050_v4 = vsel %vm410_vm4, %v1039_v3, 0.0 }
 0x68e   :  { %1051 = vadd.xlane.f32.xlu0 %v1050_v4 }
 0x68f   :  { %v3707_v5 = vpop.eup %3706 }
 0x690   :  { %v1040_v44 = vsel %vm54_vm8, %v3707_v5, 0.0  ;;  %v850_v5 = vadd.f32 %v4197_v11, %v660_v19  ;;  %vm1548_vm8 = vcmask 1043456  }
 0x691   :  { %v1053_v7 = vsel %vm410_vm4, %v1040_v44, 0.0 }
 0x692   :  { %1054 = vadd.xlane.f32.xlu1 %v1053_v7 }
 0x6ac   :  { %v1407_v57 = vpop.f32.mrf.mxu0 }
 0x6ad   :  { %v1408_v22 = vadd.f32 %v1407_v57, %v1265_v54  ;;  %v4389_v57 = vrot.slane %v3211_v59, %v4204_v18 }
 0x6ae   :  { %v1409_v60 = vpop.f32.mrf.mxu0 }
 0x70b   :  { %v1043_v10 = vpop.xlane.xlu1 %1042 }
 0x70c   :  { %vm1056_vm15 = vcmp.gt.f32.partialorder %v1043_v10, 0.0 }
 0x70d   :  { %v1061_v13 = vsel %vm1056_vm15, %v1043_v10, 1.0 }
 0x70e   :  { %3708 = vrcp.f32 %v1061_v13 }
 0x70f   :  { %v1046_v14 = vpop.xlane.xlu0 %1045 }
 0x710   :  { %vm1057_vm3 = vcmp.gt.f32.partialorder %v1046_v14, 0.0 }
 0x711   :  { %v1062_v15 = vsel %vm1057_vm3, %v1046_v14, 1.0  ;;  %v159_v14 = vadd.f32 %v3158_v61, %v3997_v33  ;;  %v169_v33 = vadd.f32 %v3158_v61, %v4001_v37  ;;  %vm2517_vm3 = vcmask 818176  }
 0x712   :  { %3710 = vrcp.f32 %v1062_v15 }
 0x713   :  { %v1049_v21 = vpop.xlane.xlu1 %1048 }
 0x714   :  { %vm1058_vm5 = vcmp.gt.f32.partialorder %v1049_v21, 0.0 }
 0x715   :  { %v1063_v23 = vsel %vm1058_vm5, %v1049_v21, 1.0  ;;  %v856_v21 = vadd.f32 %v4201_v17, %v660_v19  ;;  %vm2759_vm5 = vcmask 123904  }
 0x716   :  { %3712 = vrcp.f32 %v1063_v23 }
 0x717   :  { %v1052_v27 = vpop.xlane.xlu0 %1051 }
 0x718   :  { %vm1059_vm6 = vcmp.gt.f32.partialorder %v1052_v27, 0.0 }
 0x719   :  { %v1064_v29 = vsel %vm1059_vm6, %v1052_v27, 1.0  ;;  %v164_v27 = vadd.f32 %v3158_v61, %v3999_v35  ;;  %vm2772_vm6 = vcmask 1045504  }
 0x71a   :  { %3714 = vrcp.f32 %v1064_v29 }
 0x71b   :  { %v3709_v30 = vpop.eup %3708  ;;  %v1055_v32 = vpop.xlane.xlu1 %1054 }
 0x71c   :  { %v1071_v34 = vmul.f32 %v3709_v30, %v1036_v25  ;;  %vm1060_vm7 = vcmp.gt.f32.partialorder %v1055_v32, 0.0  ;;  %v1410_v25 = vadd.f32 %v1409_v60, %v1267_v55  ;;  %v862_v30 = vadd.f32 %v4214_v28, %v660_v19 }
 0x71d   :  { %v1065_v38 = vsel %vm1060_vm7, %v1055_v32, 1.0  ;;  %vm2812_vm7 = vcmask 392192  }
 0x71e   :  { %3716 = vrcp.f32 %v1065_v38  ;;  %3504 = vmatmul.mubr.msk.f32.vlgmr.msra.gmra.mxu1 %vm410_vm4, %v1071_v34  ;;  %v1505_v12 = vadd.f32 %v4362_v16, %v1410_v25  ;;  %v4391_v25 = vrot.slane %v3211_v59, %v659_v58 }
 0x71f   :  { %v3711_v42 = vpop.eup %3710  ;;  %3506 = vmatprep.mubr.msk.f32.mxu1 %vm3846_vm0, %v3845_v0  ;;  %1301 = vmatpush1.msra.mxu1 %v4321_v36 }
 0x720   :  { %v1072_v43 = vmul.f32 %v3711_v42, %v1037_v24  ;;  %1442 = vmatprep.subr.mxu1 %v4326_v40  ;;  %v4365_v24 = vrot.slane %v3211_v59, %v4230_v49  ;;  %v3213_v7 = vmul.f32 -1.442695, %v1505_v12 }
 0x722   :  { %3507 = vmatmul.mubr.msk.f32.gmra.mxu1 %vm410_vm4, %v1072_v43  ;;  %v1504_v41 = vadd.f32 %v4365_v24, %v1408_v22  ;;  %3718 = vpow2.f32 %v3213_v7  ;;  %v868_v43 = vadd.f32 %v867_v63, %v660_v19 }
 0x723   :  { %v3713_v45 = vpop.eup %3712  ;;  %3509 = vmatprep.mubr.msk.f32.mxu1 %vm3846_vm0, %v3845_v0 }
 0x724   :  { %v1073_v46 = vmul.f32 %v3713_v45, %v1038_v1  ;;  %v844_v1 = vadd.f32 %v4195_v6, %v660_v19  ;;  %v3212_v10 = vmul.f32 -1.442695, %v1504_v41 }
 0x726   :  { %3510 = vmatmul.mubr.msk.f32.gmra.mxu1 %vm410_vm4, %v1073_v46  ;;  %3720 = vpow2.f32 %v3212_v10  ;;  %v174_v46 = vadd.f32 %v3158_v61, %v4003_v39 }
 0x727   :  { %v3715_v47 = vpop.eup %3714  ;;  %3512 = vmatprep.mubr.msk.f32.mxu1 %vm3846_vm0, %v3845_v0 }
 0x728   :  { %v1074_v48 = vmul.f32 %v3715_v47, %v1039_v3  ;;  %v154_v3 = vadd.f32 %v3158_v61, %v3995_v31 }
 0x72a   :  { %3513 = vmatmul.mubr.msk.f32.gmra.mxu1 %vm410_vm4, %v1074_v48 }
 0x72b   :  { %v3717_v51 = vpop.eup %3716  ;;  %3515 = vmatprep.mubr.msk.f32.mxu1 %vm3846_vm0, %v3845_v0 }
 0x72c   :  { %v1075_v52 = vmul.f32 %v3717_v51, %v1040_v44 }
 0x72e   :  { %3516 = vmatmul.mubr.msk.f32.gmra.mxu1 %vm410_vm4, %v1075_v52 }
 0x72f   :  { %1334 = vmatprep.mubr.f32.mxu1 %v3845_v0  ;;  %v3719_v51 = vpop.eup %3718 }
 0x730   :  { %v1517_v55 = vadd.f32 1.0, %v3719_v51 }
 0x732   :  { %1335 = vmatmul.mubr.f32.vlgmr.msra.gmra.mxu1 %v3845_v0  ;;  %3722 = vrcp.f32 %v1517_v55 }
 0x733   :  { %1443 = vmatpush1.msra.mxu1 %v4347_v53  ;;  %1476 = vmatprep.mubr.f32.mxu1 %v3845_v0  ;;  %v3721_v28 = vpop.eup %3720 }
 0x734   :  { %3535 = vmatprep.subr.mxu1 %v3845_v0  ;;  %v1511_v37 = vadd.f32 1.0, %v3721_v28 }
 0x736   :  { %1477 = vmatmul.mubr.f32.vlgmr.msra.gmra.mxu1 %v3845_v0  ;;  %3724 = vrcp.f32 %v1511_v37 }
 0x737   :  { %3545 = vmatprep.mubr.msk.f32.mxu1 %vm3846_vm0, %v3845_v0 }
 0x73f   :  { %v3723_v12 = vpop.eup %3722 }
 0x7de   :  { %v1157_v2 = vpop.f32.mrf.mxu1 }
 0x7df   :  { %v1158_v20 = vadd.f32 %v1157_v2, %v844_v1  ;;  %v3725_v2 = vpop.eup %3724 }
 0x7e0   :  { %v3505_v4 = vpop.f32.mrf.mxu1 }
 0x7e1   :  { %v4372_v44 = vadd.f32 %v1158_v20, %v154_v3  ;;  %v1527_v3 = vmul.f32 0.0, %v3723_v12 }
 0x7e2   :  { %v1162_v13 = vpop.f32.mrf.mxu1 }
 0x7e3   :  { %v1163_v15 = vadd.f32 %v1162_v13, %v850_v5  ;;  %v4403_v13 = vld [vmem:[%s4895_s2] sm:$0xff] }
 0x7e4   :  { %v3508_v6 = vpop.f32.mrf.mxu1  ;;  %vm1662_vm10 = vcmp.gt.f32.partialorder %v4403_v13, 0.5 }
 0x7e5   :  { %v4376_v23 = vadd.f32 %v1163_v15, %v159_v14  ;;  %v4415_v14 = vld [vmem:[%s4895_s2 + $0x8] sm:$0xff]  ;;  %v4444_v15 = vld [vmem:[%s4895_s2 + $0x20] sm:$0xff] }
 0x7e6   :  { %v1167_v31 = vpop.f32.mrf.mxu1  ;;  %vm1666_vm11 = vcmp.gt.f32.partialorder %v4444_v15, 0.5  ;;  %vm1663_vm12 = vcmp.gt.f32.partialorder %v4415_v14, 0.5 }
 0x7e7   :  { %v1168_v29 = vadd.f32 %v1167_v31, %v856_v21 }
 0x7e8   :  { %v3511_v11 = vpop.f32.mrf.mxu1 }
 0x7e9   :  { %v4380_v32 = vadd.f32 %v1168_v29, %v164_v27 }
 0x7ea   :  { %v1172_v34 = vpop.f32.mrf.mxu1 }
 0x7eb   :  { %v1173_v38 = vadd.f32 %v1172_v34, %v862_v30 }
 0x7ec   :  { %v3514_v42 = vpop.f32.mrf.mxu1 }
 0x7ed   :  { %v4383_v17 = vadd.f32 %v1173_v38, %v169_v33 }
 0x7ee   :  { %v1177_v45 = vpop.f32.mrf.mxu1 }
 0x7ef   :  { %v1178_v47 = vadd.f32 %v1177_v45, %v868_v43 }
 0x7f0   :  { %v3517_v48 = vpop.f32.mrf.mxu1 }
 0x7f1   :  { %v4386_v35 = vadd.f32 %v1178_v47, %v174_v46 }
 0x7f2   :  { %v1336_v52 = vpop.f32.mrf.mxu1 }
 0x7f4   :  { %v1338_v54 = vpop.f32.mrf.mxu1 }
 0x7f6   :  { %v1478_v60 = vpop.f32.mrf.mxu1 }
 0x7f7   :  { %v1479_v19 = vadd.f32 %v1478_v60, %v1336_v52 }
 0x7f8   :  { %v1480_v22 = vpop.f32.mrf.mxu1 }
 0x7f9   :  { %v1506_v39 = vadd.f32 %v4389_v57, %v1479_v19  ;;  %v1481_v61 = vadd.f32 %v1480_v22, %v1338_v54 }
 0x7fb   :  { %3726 = vtanh.f32 %v1506_v39  ;;  %v1507_v63 = vadd.f32 %v4391_v25, %v1481_v61 }
 0x7fd   :  { %v3214_v1 = vmul.f32 -1.442695, %v1507_v63 }
 0x7ff   :  { %3728 = vpow2.f32 %v3214_v1 }
 0x808   :  { %v3727_v41 = vpop.eup %3726 }
 0x809   :  { %v1528_v20 = vmul.f32 %v3727_v41, %v3725_v2 }
 0x80b   :  { %v4395_v4 = vadd.f32 %v1528_v20, %v1527_v3 }
 0x80c   :  { %v3729_v58 = vpop.eup %3728 }
 0x80d   :  { %v1524_v59 = vadd.f32 1.0, %v3729_v58  ;;  %3730 = vtanh.f32 %v4395_v4 }
 0x80f   :  { %3732 = vrcp.f32 %v1524_v59 }
 0x81a   :  { %v3731_v5 = vpop.eup %3730 }
 0x81c   :  { %v3733_v7 = vpop.eup %3732 }
 0x81d   :  { %v4398_v10 = vmul.f32 %v3733_v7, %v3731_v5 }
 0x81f   :  { %3519 = vmatpush3.msk.msra.mxu0 %vm1548_vm8, %v4398_v10 }
 0x820   :  { %3521 = vmatmul.mubr.msk.f32.vlgmr.msra.gmra.mxu0 %vm1532_vm9, %v4403_v13  ;;  %2098 = vmatprep.subr.mxu0 %v4326_v40  ;;  %v4426_v40 = vld [vmem:[%s4895_s2 + $0x10] sm:$0xff] }
 0x821   :  { %3523 = vmatprep.mubr.msk.f32.mxu0 %vm3846_vm0, %v3845_v0  ;;  %2099 = vmatpush1.msra.mxu0 %v4347_v53  ;;  %v4435_v53 = vld [vmem:[%s4895_s2 + $0x18] sm:$0xff]  ;;  %vm1664_vm15 = vcmp.gt.f32.partialorder %v4426_v40, 0.5 }
 0x822   :  { %3565 = vmatprep.subr.mxu0 %v3845_v0  ;;  %vm1665_vm13 = vcmp.gt.f32.partialorder %v4435_v53, 0.5 }
 0x824   :  { %3524 = vmatmul.mubr.msk.f32.gmra.mxu0 %vm1532_vm9, %v4415_v14 }
 0x825   :  { %3526 = vmatprep.mubr.msk.f32.mxu0 %vm3846_vm0, %v3845_v0 }
 0x828   :  { %3527 = vmatmul.mubr.msk.f32.gmra.mxu0 %vm1532_vm9, %v4426_v40 }
 0x829   :  { %3529 = vmatprep.mubr.msk.f32.mxu0 %vm3846_vm0, %v3845_v0 }
 0x82c   :  { %3530 = vmatmul.mubr.msk.f32.gmra.mxu0 %vm1532_vm9, %v4435_v53 }
 0x82d   :  { %3532 = vmatprep.mubr.msk.f32.mxu0 %vm3846_vm0, %v3845_v0 }
 0x830   :  { %3533 = vmatmul.mubr.msk.f32.gmra.mxu0 %vm1532_vm9, %v4444_v15 }
 0x831   :  { %2132 = vmatprep.mubr.f32.mxu0 %v3845_v0 }
 0x834   :  { %3225 = vmatmul.mubr.msk.f32.vlgmr.msra.gmra.mxu0 %vm870_vm14, %v4398_v10 }
 0x835   :  { %3575 = vmatprep.mubr.msk.f32.mxu0 %vm3846_vm0, %v3845_v0 }
 0x8e0   :  { %v1618_v6 = vpop.f32.mrf.mxu0 }
 0x8e1   :  { %v1642_v21 = vmul.f32 %v1618_v6, %v4372_v44 }
 0x8e2   :  { %v3522_v31 = vpop.f32.mrf.mxu0 }
 0x8e3   :  { %v1647_v27 = vsel %vm870_vm14, %v1642_v21, 0.0 }
 0x8e4   :  { %1648 = vadd.xlane.f32.xlu0 %v1647_v27  ;;  %v1623_v29 = vpop.f32.mrf.mxu0 }
 0x8e5   :  { %v1643_v11 = vmul.f32 %v1623_v29, %v4376_v23 }
 0x8e6   :  { %v3525_v30 = vpop.f32.mrf.mxu0 }
 0x8e7   :  { %v1650_v34 = vsel %vm870_vm14, %v1643_v11, 0.0 }
 0x8e8   :  { %1651 = vadd.xlane.f32.xlu0 %v1650_v34  ;;  %v1628_v33 = vpop.f32.mrf.mxu0 }
 0x8e9   :  { %v1644_v52 = vmul.f32 %v1628_v33, %v4380_v32 }
 0x8ea   :  { %v3528_v38 = vpop.f32.mrf.mxu0 }
 0x8eb   :  { %v1653_v54 = vsel %vm870_vm14, %v1644_v52, 0.0 }
 0x8ec   :  { %v1633_v42 = vpop.f32.mrf.mxu0 }
 0x8ed   :  { %v1645_v43 = vmul.f32 %v1633_v42, %v4383_v17 }
 0x8ee   :  { %v3531_v45 = vpop.f32.mrf.mxu0 }
 0x8ef   :  { %v1656_v46 = vsel %vm870_vm14, %v1645_v43, 0.0 }
 0x8f0   :  { %1657 = vadd.xlane.f32.xlu0 %v1656_v46  ;;  %v1638_v47 = vpop.f32.mrf.mxu0 }
 0x8f1   :  { %v1646_v48 = vmul.f32 %v1638_v47, %v4386_v35 }
 0x8f2   :  { %v3534_v51 = vpop.f32.mrf.mxu0 }
 0x8f3   :  { %v1659_v28 = vsel %vm870_vm14, %v1646_v48, 0.0 }
 0x8f4   :  { %1660 = vadd.xlane.f32.xlu1 %v1659_v28 }
 0x8f8   :  { %1654 = vadd.xlane.f32.xlu1 %v1653_v54 }
 0x96d   :  { %v1649_v55 = vpop.xlane.xlu0 %1648 }
 0x96e   :  { %v1667_v60 = vsel %vm1662_vm10, %v1649_v55, -1e+30 }
 0x96f   :  { %v1672_v61 = vsel %vm1532_vm9, %v1667_v60, -inf }
 0x971   :  { %v1652_v37 = vpop.xlane.xlu0 %1651 }
 0x972   :  { %v1668_v1 = vsel %vm1663_vm12, %v1652_v37, -1e+30 }
 0x973   :  { %v1673_v20 = vsel %vm1532_vm9, %v1668_v1, -inf }
 0x979   :  { %v1658_v19 = vpop.xlane.xlu0 %1657 }
 0x97a   :  { %v1670_v12 = vsel %vm1665_vm13, %v1658_v19, -1e+30 }
 0x97b   :  { %v1675_v58 = vsel %vm1532_vm9, %v1670_v12, -inf }
 0x97d   :  { %v1661_v22 = vpop.xlane.xlu1 %1660 }
 0x97e   :  { %v1671_v39 = vsel %vm1666_vm11, %v1661_v22, -1e+30 }
 0x97f   :  { %v1676_v63 = vsel %vm1532_vm9, %v1671_v39, -inf }
 0x980   :  { %v1677_v2 = vmax.f32 %v1672_v61, %v1676_v63 }
 0x981   :  { %v1655_v41 = vpop.xlane.xlu1 %1654 }
 0x982   :  { %v1669_v3 = vsel %vm1664_vm15, %v1655_v41, -1e+30  ;;  %v1678_v5 = vmax.f32 %v1677_v2, %v1673_v20 }
 0x983   :  { %v1674_v59 = vsel %vm1532_vm9, %v1669_v3, -inf }
 0x984   :  { %v1679_v7 = vmax.f32 %v1674_v59, %v1675_v58 }
 0x986   :  { %v1680_v6 = vmax.f32 %v1678_v5, %v1679_v7 }
 0x988   :  { %v1681_v21 = vrot.slane %v1680_v6, 4 }
 0x98a   :  { %v1682_v31 = vmax.f32 %v1680_v6, %v1681_v21 }
 0x98c   :  { %v1683_v27 = vrot.slane %v1682_v31, 2 }
 0x98e   :  { %v1684_v29 = vmax.f32 %v1682_v31, %v1683_v27 }
 0x990   :  { %v1685_v11 = vrot.slane %v1684_v29, 1 }
 0x992   :  { %v1686_v30 = vmax.f32 %v1684_v29, %v1685_v11 }
 0x994   :  { %v1688_v34 = vmul.f32 %v1686_v30, %v4415_v14  ;;  %v1687_v33 = vmul.f32 %v1686_v30, %v4403_v13  ;;  %v1690_v43 = vmul.f32 %v1686_v30, %v4435_v53  ;;  %v1689_v45 = vmul.f32 %v1686_v30, %v4426_v40 }
 0x995   :  { %v1691_v48 = vmul.f32 %v1686_v30, %v4444_v15 }
 0x996   :  { %v1695_v38 = vsel %vm1532_vm9, %v1688_v34, 0.0  ;;  %v1692_v42 = vsel %vm1532_vm9, %v1687_v33, 0.0  ;;  %v1701_v46 = vsel %vm1532_vm9, %v1690_v43, 0.0  ;;  %v1698_v47 = vsel %vm1532_vm9, %v1689_v45, 0.0 }
 0x997   :  { %1696 = vadd.xlane.f32.xlu0 %v1695_v38  ;;  %1693 = vadd.xlane.f32.xlu1 %v1692_v42  ;;  %v1704_v51 = vsel %vm1532_vm9, %v1691_v48, 0.0 }
 0x99b   :  { %1702 = vadd.xlane.f32.xlu0 %v1701_v46  ;;  %1699 = vadd.xlane.f32.xlu1 %v1698_v47 }
 0x99f   :  { %1705 = vadd.xlane.f32.xlu1 %v1704_v51 }
 0xa20   :  { %v1697_v52 = vpop.xlane.xlu0 %1696  ;;  %v1694_v28 = vpop.xlane.xlu1 %1693 }
 0xa21   :  { %v1708_v54 = vsub.f32 %v1652_v37, %v1697_v52  ;;  %v1707_v60 = vsub.f32 %v1649_v55, %v1694_v28 }
 0xa23   :  { %v1714_v39 = vmul.f32 1.442695, %v1708_v54  ;;  %v1712_v61 = vmul.f32 1.442695, %v1707_v60 }
 0xa24   :  { %v1703_v63 = vpop.xlane.xlu0 %1702  ;;  %v1700_v1 = vpop.xlane.xlu1 %1699 }
 0xa25   :  { %3734 = vpow2.f32 %v1714_v39  ;;  %v1710_v12 = vsub.f32 %v1658_v19, %v1703_v63  ;;  %v1709_v2 = vsub.f32 %v1655_v41, %v1700_v1 }
 0xa26   :  { %3736 = vpow2.f32 %v1712_v61 }
 0xa27   :  { %v1718_v3 = vmul.f32 1.442695, %v1710_v12  ;;  %v1716_v20 = vmul.f32 1.442695, %v1709_v2 }
 0xa28   :  { %v1706_v58 = vpop.xlane.xlu1 %1705 }
 0xa29   :  { %3738 = vpow2.f32 %v1718_v3  ;;  %v1711_v59 = vsub.f32 %v1661_v22, %v1706_v58 }
 0xa2a   :  { %3740 = vpow2.f32 %v1716_v20 }
 0xa2b   :  { %v1720_v5 = vmul.f32 1.442695, %v1711_v59 }
 0xa2d   :  { %3742 = vpow2.f32 %v1720_v5 }
 0xa32   :  { %v3735_v7 = vpop.eup %3734 }
 0xa33   :  { %v4493_v6 = vpop.eup %3736  ;;  %v1723_v55 = vmul.f32 %v3735_v7, %v4415_v14 }
 0xa34   :  { %v1722_v37 = vmul.f32 %v4493_v6, %v4403_v13 }
 0xa35   :  { %v1728_v19 = vsel %vm1532_vm9, %v1723_v55, 0.0 }
 0xa36   :  { %v3739_v21 = vpop.eup %3738  ;;  %v1727_v41 = vsel %vm1532_vm9, %v1722_v37, 0.0 }
 0xa37   :  { %v3741_v31 = vpop.eup %3740  ;;  %v1725_v27 = vmul.f32 %v3739_v21, %v4435_v53  ;;  %v1729_v29 = vadd.f32 %v1728_v19, %v1727_v41 }
 0xa38   :  { %v1724_v22 = vmul.f32 %v3741_v31, %v4426_v40 }
 0xa39   :  { %v1732_v38 = vsel %vm1532_vm9, %v1725_v27, 0.0 }
 0xa3a   :  { %v3743_v11 = vpop.eup %3742  ;;  %v1730_v30 = vsel %vm1532_vm9, %v1724_v22, 0.0 }
 0xa3b   :  { %v1731_v34 = vadd.f32 %v1730_v30, %v1729_v29  ;;  %v1726_v33 = vmul.f32 %v3743_v11, %v4444_v15 }
 0xa3d   :  { %v1733_v42 = vadd.f32 %v1732_v38, %v1731_v34  ;;  %v1734_v43 = vsel %vm1532_vm9, %v1726_v33, 0.0 }
 0xa3f   :  { %v1735_v45 = vadd.f32 %v1734_v43, %v1733_v42 }
 0xa41   :  { %v1736_v46 = vrot.slane %v1735_v45, 4 }
 0xa43   :  { %v1737_v47 = vadd.f32 %v1736_v46, %v1735_v45 }
 0xa45   :  { %v1738_v48 = vrot.slane %v1737_v47, 2 }
 0xa47   :  { %v1739_v51 = vadd.f32 %v1738_v48, %v1737_v47 }
 0xa49   :  { %v1740_v52 = vrot.slane %v1739_v51, 1 }
 0xa4b   :  { %v1741_v28 = vadd.f32 %v1740_v52, %v1739_v51  ;;  %v2134_v52 = vpop.f32.mrf.mxu0 }
 0xa4d   :  { %v1746_v54 = vmul.f32 %v1741_v28, %v4444_v15  ;;  %v1745_v60 = vmul.f32 %v1741_v28, %v4435_v53  ;;  %v1744_v63 = vmul.f32 %v1741_v28, %v4426_v40  ;;  %v1743_v1 = vmul.f32 %v1741_v28, %v4415_v14 }
 0xa4e   :  { %v1742_v3 = vmul.f32 %v1741_v28, %v4403_v13 }
 0xa4f   :  { %v1759_v39 = vsel %vm1532_vm9, %v1746_v54, 0.0  ;;  %v1756_v61 = vsel %vm1532_vm9, %v1745_v60, 0.0  ;;  %v1753_v12 = vsel %vm1532_vm9, %v1744_v63, 0.0  ;;  %v1750_v2 = vsel %vm1532_vm9, %v1743_v1, 0.0 }
 0xa50   :  { %1760 = vadd.xlane.f32.xlu0 %v1759_v39  ;;  %1757 = vadd.xlane.f32.xlu1 %v1756_v61  ;;  %v1747_v20 = vsel %vm1532_vm9, %v1742_v3, 0.0 }
 0xa54   :  { %1754 = vadd.xlane.f32.xlu0 %v1753_v12  ;;  %1751 = vadd.xlane.f32.xlu1 %v1750_v2 }
 0xa58   :  { %1748 = vadd.xlane.f32.xlu0 %v1747_v20 }
 0xad9   :  { %v1761_v58 = vpop.xlane.xlu0 %1760  ;;  %v1758_v59 = vpop.xlane.xlu1 %1757 }
 0xada   :  { %3744 = vrcp.f32 %v1761_v58 }
 0xadb   :  { %3746 = vrcp.f32 %v1758_v59 }
 0xadd   :  { %v1755_v5 = vpop.xlane.xlu0 %1754  ;;  %v1752_v55 = vpop.xlane.xlu1 %1751 }
 0xade   :  { %3748 = vrcp.f32 %v1755_v5 }
 0xadf   :  { %3750 = vrcp.f32 %v1752_v55 }
 0xae1   :  { %v1749_v37 = vpop.xlane.xlu0 %1748 }
 0xae2   :  { %3752 = vrcp.f32 %v1749_v37 }
 0xae7   :  { %v3745_v19 = vpop.eup %3744 }
 0xae8   :  { %v3747_v41 = vpop.eup %3746  ;;  %v1771_v27 = vmul.f32 %v3745_v19, %v3743_v11 }
 0xae9   :  { %v1770_v22 = vmul.f32 %v3747_v41, %v3739_v21 }
 0xaea   :  { %v1776_v29 = vmul.f32 %v1771_v27, %v4386_v35 }
 0xaeb   :  { %v3749_v30 = vpop.eup %3748  ;;  %v1775_v33 = vmul.f32 %v1770_v22, %v4383_v17 }
 0xaec   :  { %v3751_v34 = vpop.eup %3750  ;;  %3536 = vmatpush3.msra.mxu1 %v1776_v29  ;;  %v1769_v38 = vmul.f32 %v3749_v30, %v3741_v31 }
 0xaed   :  { %3537 = vmatprep.subr.mxu1 %v3845_v0  ;;  %v1768_v42 = vmul.f32 %v3751_v34, %v3735_v7  ;;  %v4528_v7 = vld [vmem:[%s4896_s3] sm:$0xf] }
 0xaee   :  { %3538 = vmatpush3.msra.mxu1 %v1775_v33  ;;  %v1774_v43 = vmul.f32 %v1769_v38, %v4380_v32 }
 0xaef   :  { %v3753_v45 = vpop.eup %3752  ;;  %3539 = vmatprep.subr.mxu1 %v3845_v0  ;;  %v1773_v21 = vmul.f32 %v1768_v42, %v4376_v23 }
 0xaf0   :  { %3540 = vmatpush3.msra.mxu1 %v1774_v43  ;;  %v1767_v11 = vmul.f32 %v3753_v45, %v4493_v6 }
 0xaf1   :  { %3541 = vmatprep.subr.mxu1 %v3845_v0 }
 0xaf2   :  { %3542 = vmatpush3.msra.mxu1 %v1773_v21  ;;  %v1772_v46 = vmul.f32 %v1767_v11, %v4372_v44 }
 0xaf3   :  { %3543 = vmatprep.subr.mxu1 %v3845_v0 }
 0xaf4   :  { %3544 = vmatpush3.msra.mxu1 %v1772_v46 }
 0xaf5   :  { %3546 = vmatmul.mubr.msk.f32.vlgmr.msra.gmra.mxu1 %vm410_vm4, %v4528_v7  ;;  %1883 = vmatprep.subr.mxu1 %v4285_v50 }
 0xaf6   :  { %1884 = vmatpush1.msra.mxu1 %v4291_v56  ;;  %1917 = vmatprep.mubr.f32.mxu1 %v3845_v0 }
 0xaf7   :  { %1954 = vmatprep.subr.mxu1 %v4312_v9 }
 0xbb5   :  { %v1846_v6 = vpop.f32.mrf.mxu1 }
 0xbb6   :  { %3222 = vmatmul.mubr.msk.f32.vlgmr.msra.gmra.mxu1 %vm870_vm14, %v1846_v6 }
 0xbb7   :  { %v3547_v31 = vpop.f32.mrf.mxu1  ;;  %1955 = vmatpush1.msra.mxu1 %v4321_v36  ;;  %1988 = vmatprep.mubr.f32.mxu1 %v3845_v0 }
 0xbb8   :  { %2027 = vmatprep.subr.mxu1 %v4298_v62 }
 0xbba   :  { %3223 = vmatmul.mubr.msk.f32.vlgmr.msra.gmra.mxu1 %vm870_vm14, %v1846_v6 }
 0xbbb   :  { %2028 = vmatpush1.msra.mxu1 %v4305_v8  ;;  %2061 = vmatprep.mubr.f32.mxu1 %v3845_v0 }
 0xbbc   :  { %3548 = vmatprep.subr.mxu1 %v3845_v0 }
 0xbbe   :  { %3224 = vmatmul.mubr.msk.f32.vlgmr.msra.gmra.mxu1 %vm870_vm14, %v4398_v10  ;;  %v2136_v10 = vpop.f32.mrf.mxu0 }
 0xbbf   :  { %3550 = vmatprep.mubr.msk.f32.mxu1 %vm3846_vm0, %v3845_v0 }
 0xc76   :  { %v1919_v50 = vpop.f32.mrf.mxu1 }
 0xc78   :  { %v1921_v56 = vpop.f32.mrf.mxu1 }
 0xc7a   :  { %v1990_v9 = vpop.f32.mrf.mxu1 }
 0xc7b   :  { %v2135_v63 = vadd.f32 %v2134_v52, %v1990_v9 }
 0xc7c   :  { %v1992_v36 = vpop.f32.mrf.mxu1 }
 0xc7d   :  { %v2137_v39 = vadd.f32 %v2136_v10, %v1992_v36  ;;  %v2141_v2 = vadd.f32 %v2135_v63, %v4389_v57 }
 0xc7e   :  { %v2063_v47 = vpop.f32.mrf.mxu1 }
 0xc7f   :  { %v2064_v62 = vadd.f32 %v2063_v47, %v1919_v50  ;;  %v2142_v61 = vadd.f32 %v2137_v39, %v4391_v25 }
 0xc80   :  { %v2065_v48 = vpop.f32.mrf.mxu1 }
 0xc81   :  { %v2139_v51 = vadd.f32 %v2064_v62, %v4365_v24  ;;  %v2066_v8 = vadd.f32 %v2065_v48, %v1921_v56  ;;  %v3228_v1 = vmul.f32 -1.442695, %v2142_v61 }
 0xc83   :  { %v3226_v28 = vmul.f32 -1.442695, %v2139_v51  ;;  %v2140_v54 = vadd.f32 %v2066_v8, %v4362_v16 }
 0xc85   :  { %3754 = vpow2.f32 %v3226_v28  ;;  %v3227_v60 = vmul.f32 -1.442695, %v2140_v54 }
 0xc87   :  { %3756 = vpow2.f32 %v3227_v60 }
 0xc88   :  { %3758 = vpow2.f32 %v3228_v1 }
 0xc92   :  { %v3755_v12 = vpop.eup %3754 }
 0xc93   :  { %v2146_v3 = vadd.f32 1.0, %v3755_v12 }
 0xc94   :  { %v3757_v20 = vpop.eup %3756 }
 0xc95   :  { %3760 = vrcp.f32 %v2146_v3  ;;  %v2152_v24 = vadd.f32 1.0, %v3757_v20  ;;  %v3759_v16 = vpop.eup %3758 }
 0xc96   :  { %3762 = vtanh.f32 %v2141_v2  ;;  %v2159_v55 = vadd.f32 1.0, %v3759_v16 }
 0xc97   :  { %3764 = vrcp.f32 %v2152_v24 }
 0xc98   :  { %3766 = vrcp.f32 %v2159_v55 }
 0xca2   :  { %v3761_v58 = vpop.eup %3760 }
 0xca3   :  { %v3763_v59 = vpop.eup %3762 }
 0xca4   :  { %v3765_v5 = vpop.eup %3764  ;;  %v2163_v37 = vmul.f32 %v3763_v59, %v3761_v58 }
 0xca5   :  { %v2162_v25 = vmul.f32 %v3765_v5, %v4395_v4  ;;  %v3767_v41 = vpop.eup %3766 }
 0xca7   :  { %v2164_v19 = vadd.f32 %v2163_v37, %v2162_v25 }
 0xca9   :  { %3768 = vtanh.f32 %v2164_v19 }
 0xcb6   :  { %v3769_v57 = vpop.eup %3768 }
 0xcb7   :  { %v4554_v27 = vmul.f32 %v3769_v57, %v3767_v41 }
 0xcb9   :  { %3549 = vmatpush3.msk.msra.mxu1 %vm1548_vm8, %v4554_v27 }
 0xcba   :  { %3551 = vmatmul.mubr.msk.f32.vlgmr.msra.gmra.mxu1 %vm1532_vm9, %v4403_v13 }
 0xcbb   :  { %3553 = vmatprep.mubr.msk.f32.mxu1 %vm3846_vm0, %v3845_v0 }
 0xcbe   :  { %3554 = vmatmul.mubr.msk.f32.gmra.mxu1 %vm1532_vm9, %v4415_v14 }
 0xcbf   :  { %3556 = vmatprep.mubr.msk.f32.mxu1 %vm3846_vm0, %v3845_v0 }
 0xcc2   :  { %3557 = vmatmul.mubr.msk.f32.gmra.mxu1 %vm1532_vm9, %v4426_v40 }
 0xcc3   :  { %3559 = vmatprep.mubr.msk.f32.mxu1 %vm3846_vm0, %v3845_v0 }
 0xcc6   :  { %3560 = vmatmul.mubr.msk.f32.gmra.mxu1 %vm1532_vm9, %v4435_v53 }
 0xcc7   :  { %3562 = vmatprep.mubr.msk.f32.mxu1 %vm3846_vm0, %v3845_v0 }
 0xcca   :  { %3563 = vmatmul.mubr.msk.f32.gmra.mxu1 %vm1532_vm9, %v4444_v15 }
 0xccb   :  { %2600 = vmatprep.mubr.f32.mxu1 %v3845_v0 }
 0xd7a   :  { %v2236_v4 = vpop.f32.mrf.mxu1 }
 0xd7b   :  { %v2260_v22 = vmul.f32 %v2236_v4, %v4372_v44 }
 0xd7c   :  { %v3552_v29 = vpop.f32.mrf.mxu1 }
 0xd7d   :  { %v2265_v30 = vsel %vm870_vm14, %v2260_v22, 0.0 }
 0xd7e   :  { %2266 = vadd.xlane.f32.xlu1 %v2265_v30  ;;  %v2241_v34 = vpop.f32.mrf.mxu1 }
 0xd7f   :  { %v2261_v33 = vmul.f32 %v2241_v34, %v4376_v23 }
 0xd80   :  { %v3555_v38 = vpop.f32.mrf.mxu1 }
 0xd81   :  { %v2268_v42 = vsel %vm870_vm14, %v2261_v33, 0.0 }
 0xd82   :  { %2269 = vadd.xlane.f32.xlu1 %v2268_v42  ;;  %v2246_v43 = vpop.f32.mrf.mxu1  ;;  %v2497_v42 = vld [vmem:[%s4898_s5 + $0x188] sm:$0xf] }
 0xd83   :  { %v2262_v9 = vmul.f32 %v2246_v43, %v4380_v32  ;;  %v2496_v43 = vld [vmem:[%s4898_s5 + $0x180] sm:$0xf]  ;;  %3237 = vmatprep.subr.msk.mxu1 %vm1548_vm8, %v2497_v42 }
 0xd84   :  { %v3558_v45 = vpop.f32.mrf.mxu1  ;;  %3238 = vmatpush1.msk.msra.mxu1 %vm1548_vm8, %v2496_v43 }
 0xd85   :  { %v2271_v47 = vsel %vm870_vm14, %v2262_v9, 0.0  ;;  %v2494_v45 = vld [vmem:[%s4898_s5 + $0x168] sm:$0xff] }
 0xd86   :  { %v2251_v21 = vpop.f32.mrf.mxu1  ;;  %2544 = vmatprep.subr.mxu1 %v2494_v45 }
 0xd87   :  { %v2263_v11 = vmul.f32 %v2251_v21, %v4383_v17  ;;  %v2493_v21 = vld [vmem:[%s4898_s5 + $0x160] sm:$0xff] }
 0xd88   :  { %v3561_v46 = vpop.f32.mrf.mxu1  ;;  %2545 = vmatpush1.msra.mxu1 %v2493_v21 }
 0xd89   :  { %v2274_v6 = vsel %vm870_vm14, %v2263_v11, 0.0  ;;  %v2491_v11 = vld [vmem:[%s4898_s5 + $0x148] sm:$0xff]  ;;  %v2490_v46 = vld [vmem:[%s4898_s5 + $0x140] sm:$0xff] }
 0xd8a   :  { %2275 = vadd.xlane.f32.xlu1 %v2274_v6  ;;  %v2256_v31 = vpop.f32.mrf.mxu1  ;;  %v2488_v6 = vld [vmem:[%s4898_s5 + $0x128] sm:$0xff]  ;;  %2546 = vmatprep.subr.mxu1 %v2491_v11 }
 0xd8b   :  { %v2264_v50 = vmul.f32 %v2256_v31, %v4386_v35  ;;  %2547 = vmatpush1.msra.mxu1 %v2490_v46 }
 0xd8c   :  { %v3564_v56 = vpop.f32.mrf.mxu1  ;;  %2548 = vmatprep.subr.mxu1 %v2488_v6 }
 0xd8d   :  { %v2277_v36 = vsel %vm870_vm14, %v2264_v50, 0.0 }
 0xd8e   :  { %2278 = vadd.xlane.f32.xlu0 %v2277_v36 }
 0xd92   :  { %2272 = vadd.xlane.f32.xlu0 %v2271_v47 }
 0xe07   :  { %v2267_v62 = vpop.xlane.xlu1 %2266 }
 0xe08   :  { %v2280_v51 = vsel %vm1662_vm10, %v2267_v62, -1e+30 }
 0xe09   :  { %v2285_v54 = vsel %vm1532_vm9, %v2280_v51, -inf }
 0xe0b   :  { %v2270_v48 = vpop.xlane.xlu1 %2269 }
 0xe0c   :  { %v2281_v10 = vsel %vm1663_vm12, %v2270_v48, -1e+30 }
 0xe0d   :  { %v2286_v12 = vsel %vm1532_vm9, %v2281_v10, -inf }
 0xe13   :  { %v4589_v8 = vpop.xlane.xlu1 %2275 }
 0xe14   :  { %v2283_v39 = vsel %vm1665_vm13, %v4589_v8, -1e+30 }
 0xe15   :  { %v2288_v2 = vsel %vm1532_vm9, %v2283_v39, -inf }
 0xe17   :  { %v4591_v52 = vpop.xlane.xlu0 %2278 }
 0xe18   :  { %v2284_v28 = vsel %vm1666_vm11, %v4591_v52, -1e+30 }
 0xe19   :  { %v2289_v60 = vsel %vm1532_vm9, %v2284_v28, -inf }
 0xe1a   :  { %v2290_v61 = vmax.f32 %v2285_v54, %v2289_v60 }
 0xe1b   :  { %v2273_v63 = vpop.xlane.xlu0 %2272 }
 0xe1c   :  { %v2282_v1 = vsel %vm1664_vm15, %v2273_v63, -1e+30  ;;  %v2291_v20 = vmax.f32 %v2290_v61, %v2286_v12 }
 0xe1d   :  { %v2287_v3 = vsel %vm1532_vm9, %v2282_v1, -inf }
 0xe1e   :  { %v2292_v24 = vmax.f32 %v2287_v3, %v2288_v2 }
 0xe20   :  { %v2293_v16 = vmax.f32 %v2291_v20, %v2292_v24 }
 0xe22   :  { %v2294_v58 = vrot.slane %v2293_v16, 4 }
 0xe24   :  { %v2295_v59 = vmax.f32 %v2293_v16, %v2294_v58 }
 0xe26   :  { %v2296_v5 = vrot.slane %v2295_v59, 2 }
 0xe28   :  { %v2297_v55 = vmax.f32 %v2295_v59, %v2296_v5 }
 0xe2a   :  { %v2298_v37 = vrot.slane %v2297_v55, 1 }
 0xe2c   :  { %v2299_v25 = vmax.f32 %v2297_v55, %v2298_v37 }
 0xe2e   :  { %v2301_v19 = vmul.f32 %v2299_v25, %v4415_v14  ;;  %v2300_v41 = vmul.f32 %v2299_v25, %v4403_v13  ;;  %v2303_v22 = vmul.f32 %v2299_v25, %v4435_v53  ;;  %v2302_v29 = vmul.f32 %v2299_v25, %v4426_v40 }
 0xe2f   :  { %v2304_v33 = vmul.f32 %v2299_v25, %v4444_v15 }
 0xe30   :  { %v2308_v57 = vsel %vm1532_vm9, %v2301_v19, 0.0  ;;  %v2305_v4 = vsel %vm1532_vm9, %v2300_v41, 0.0  ;;  %v2314_v30 = vsel %vm1532_vm9, %v2303_v22, 0.0  ;;  %v2311_v34 = vsel %vm1532_vm9, %v2302_v29, 0.0 }
 0xe31   :  { %2309 = vadd.xlane.f32.xlu1 %v2308_v57  ;;  %2306 = vadd.xlane.f32.xlu0 %v2305_v4  ;;  %v2317_v38 = vsel %vm1532_vm9, %v2304_v33, 0.0 }
 0xe35   :  { %2315 = vadd.xlane.f32.xlu1 %v2314_v30  ;;  %2312 = vadd.xlane.f32.xlu0 %v2311_v34 }
 0xe39   :  { %2318 = vadd.xlane.f32.xlu0 %v2317_v38 }
 0xeba   :  { %v2310_v31 = vpop.xlane.xlu1 %2309  ;;  %v2307_v50 = vpop.xlane.xlu0 %2306 }
 0xebb   :  { %v2321_v56 = vsub.f32 %v2270_v48, %v2310_v31  ;;  %v2320_v9 = vsub.f32 %v2267_v62, %v2307_v50  ;;  %v2481_v50 = vld [vmem:[%s4898_s5 + $0xe0] sm:$0xff] }
 0xebd   :  { %v2327_v36 = vmul.f32 1.442695, %v2321_v56  ;;  %v2325_v47 = vmul.f32 1.442695, %v2320_v9  ;;  %v2479_v56 = vld [vmem:[%s4898_s5 + $0xc8] sm:$0xff]  ;;  %v2478_v9 = vld [vmem:[%s4898_s5 + $0xc0] sm:$0xff] }
 0xebe   :  { %v2316_v51 = vpop.xlane.xlu1 %2315  ;;  %v2313_v28 = vpop.xlane.xlu0 %2312 }
 0xebf   :  { %3770 = vpow2.f32 %v2327_v36  ;;  %v2323_v54 = vsub.f32 %v4589_v8, %v2316_v51  ;;  %v2322_v60 = vsub.f32 %v2273_v63, %v2313_v28  ;;  %v2476_v36 = vld [vmem:[%s4898_s5 + $0xa8] sm:$0xff]  ;;  %v2472_v28 = vld [vmem:[%s4898_s5 + $0x80] sm:$0xff] }
 0xec0   :  { %3772 = vpow2.f32 %v2325_v47  ;;  %v2475_v47 = vld [vmem:[%s4898_s5 + $0xa0] sm:$0xff]  ;;  %v2473_v51 = vld [vmem:[%s4898_s5 + $0x88] sm:$0xff] }
 0xec1   :  { %v2331_v10 = vmul.f32 1.442695, %v2323_v54  ;;  %v2329_v39 = vmul.f32 1.442695, %v2322_v60  ;;  %v2470_v54 = vld [vmem:[%s4898_s5 + $0x68] sm:$0xff]  ;;  %v2469_v60 = vld [vmem:[%s4898_s5 + $0x60] sm:$0xff] }
 0xec2   :  { %v2319_v61 = vpop.xlane.xlu0 %2318 }
 0xec3   :  { %3774 = vpow2.f32 %v2331_v10  ;;  %v2324_v1 = vsub.f32 %v4591_v52, %v2319_v61  ;;  %v2467_v10 = vld [vmem:[%s4898_s5 + $0x48] sm:$0xff] }
 0xec4   :  { %3776 = vpow2.f32 %v2329_v39  ;;  %v2466_v39 = vld [vmem:[%s4898_s5 + $0x40] sm:$0xff]  ;;  %v2464_v61 = vld [vmem:[%s4898_s5 + $0x28] sm:$0xff] }
 0xec5   :  { %v2333_v12 = vmul.f32 1.442695, %v2324_v1  ;;  %v2463_v1 = vld [vmem:[%s4898_s5 + $0x20] sm:$0xff] }
 0xec7   :  { %3778 = vpow2.f32 %v2333_v12  ;;  %v2796_v12 = vrot.slane %v4554_v27, 2 }
 0xecc   :  { %v4643_v48 = vpop.eup %3770 }
 0xecd   :  { %v4645_v62 = vpop.eup %3772  ;;  %v2336_v2 = vmul.f32 %v4643_v48, %v4415_v14 }
 0xece   :  { %v2335_v8 = vmul.f32 %v4645_v62, %v4403_v13 }
 0xecf   :  { %v2341_v3 = vsel %vm1532_vm9, %v2336_v2, 0.0  ;;  %v2461_v2 = vld [vmem:[%s4898_s5 + $0x8] sm:$0xff] }
 0xed0   :  { %v4651_v63 = vpop.eup %3774  ;;  %v2340_v20 = vsel %vm1532_vm9, %v2335_v8, 0.0  ;;  %v2460_v8 = vld [vmem:[%s4898_s5] sm:$0xff] }
 0xed1   :  { %v4655_v52 = vpop.eup %3776  ;;  %v2338_v24 = vmul.f32 %v4651_v63, %v4435_v53  ;;  %v2342_v58 = vadd.f32 %v2341_v3, %v2340_v20  ;;  %v4740_v3 = vld [vmem:[%s4897_s4] sm:$0xff]  ;;  %v4749_v20 = vld [vmem:[%s4897_s4 + $0x8] sm:$0xff] }
 0xed2   :  { %v2337_v16 = vmul.f32 %v4655_v52, %v4426_v40 }
 0xed3   :  { %v2345_v25 = vsel %vm1532_vm9, %v2338_v24, 0.0  ;;  %v4757_v24 = vld [vmem:[%s4897_s4 + $0x10] sm:$0xf]  ;;  %s3852_s4 = smov 48  }
 0xed4   :  { %v4661_v59 = vpop.eup %3778  ;;  %v2343_v5 = vsel %vm1532_vm9, %v2337_v16, 0.0 }
 0xed5   :  { %v2344_v55 = vadd.f32 %v2343_v5, %v2342_v58  ;;  %v2339_v37 = vmul.f32 %v4661_v59, %v4444_v15 }
 0xed7   :  { %v2346_v19 = vadd.f32 %v2345_v25, %v2344_v55  ;;  %v2347_v41 = vsel %vm1532_vm9, %v2339_v37, 0.0 }
 0xed9   :  { %v2348_v57 = vadd.f32 %v2347_v41, %v2346_v19 }
 0xedb   :  { %v2349_v4 = vrot.slane %v2348_v57, 4 }
 0xedd   :  { %v2350_v22 = vadd.f32 %v2349_v4, %v2348_v57 }
 0xedf   :  { %v2351_v29 = vrot.slane %v2350_v22, 2 }
 0xee1   :  { %v2352_v30 = vadd.f32 %v2351_v29, %v2350_v22 }
 0xee3   :  { %v2353_v34 = vrot.slane %v2352_v30, 1 }
 0xee5   :  { %v2354_v33 = vadd.f32 %v2353_v34, %v2352_v30 }
 0xee7   :  { %v2359_v38 = vmul.f32 %v2354_v33, %v4444_v15  ;;  %v2358_v42 = vmul.f32 %v2354_v33, %v4435_v53  ;;  %v2357_v21 = vmul.f32 %v2354_v33, %v4426_v40  ;;  %v2356_v11 = vmul.f32 %v2354_v33, %v4415_v14  ;;  %v2487_v15 = vld [vmem:[%s4898_s5 + $0x120] sm:$0xff]  ;;  %v2485_v14 = vld [vmem:[%s4898_s5 + $0x108] sm:$0xff] }
 0xee8   :  { %v2355_v31 = vmul.f32 %v2354_v33, %v4403_v13  ;;  %2549 = vmatpush1.msra.mxu1 %v2487_v15  ;;  %v2484_v40 = vld [vmem:[%s4898_s5 + $0x100] sm:$0xff]  ;;  %v2482_v13 = vld [vmem:[%s4898_s5 + $0xe8] sm:$0xff] }
 0xee9   :  { %v2372_v43 = vsel %vm1532_vm9, %v2359_v38, 0.0  ;;  %v2369_v45 = vsel %vm1532_vm9, %v2358_v42, 0.0  ;;  %v2366_v46 = vsel %vm1532_vm9, %v2357_v21, 0.0  ;;  %v2363_v6 = vsel %vm1532_vm9, %v2356_v11, 0.0  ;;  %2550 = vmatprep.subr.mxu1 %v2485_v14  ;;  %v2468_v21 = vld [vmem:[%s4898_s5 + $0x50] sm:$0xff] }
 0xeea   :  { %2373 = vadd.xlane.f32.xlu1 %v2372_v43  ;;  %2370 = vadd.xlane.f32.xlu0 %v2369_v45  ;;  %v2360_v53 = vsel %vm1532_vm9, %v2355_v31, 0.0  ;;  %v2474_v43 = vld [vmem:[%s4898_s5 + $0x90] sm:$0xff] }
 0xeeb   :  { %2551 = vmatpush1.msra.mxu1 %v2484_v40  ;;  %v2471_v45 = vld [vmem:[%s4898_s5 + $0x70] sm:$0xff] }
 0xeec   :  { %2552 = vmatprep.subr.mxu1 %v2482_v13  ;;  %v2465_v11 = vld [vmem:[%s4898_s5 + $0x30] sm:$0xff] }
 0xeed   :  { %2553 = vmatpush1.msra.mxu1 %v2481_v50  ;;  %v3236_v31 = vld [vmem:[%s4898_s5 + $0x260] ss:$8 sm:$0x7] }
 0xeee   :  { %2367 = vadd.xlane.f32.xlu1 %v2366_v46  ;;  %2364 = vadd.xlane.f32.xlu0 %v2363_v6  ;;  %v2462_v46 = vld [vmem:[%s4898_s5 + $0x10] sm:$0xff]  ;;  %v2505_v15 = vrot.slane %v3236_v31, %v4230_v49  ;;  %v2509_v49 = vrot.slane %v3236_v31, %v4212_v26 }
 0xeef   :  { %2554 = vmatprep.subr.mxu1 %v2479_v56 }
 0xef0   :  { %2555 = vmatpush1.msra.mxu1 %v2478_v9 }
 0xef1   :  { %2556 = vmatprep.subr.mxu1 %v2476_v36 }
 0xef2   :  { %2361 = vadd.xlane.f32.xlu1 %v2360_v53  ;;  %2557 = vmatpush1.msra.mxu1 %v2475_v47 }
 0xef3   :  { %2558 = vmatprep.subr.mxu1 %v2473_v51  ;;  %v2821_v51 = vld [vmem:[#allocation2 + $0x58] sm:$0xff] }
 0xef4   :  { %2559 = vmatpush1.msra.mxu1 %v2472_v28  ;;  %v2820_v28 = vld [vmem:[#allocation2 + $0x50] sm:$0xff] }
 0xef5   :  { %2560 = vmatprep.subr.mxu1 %v2470_v54 }
 0xef6   :  { %2561 = vmatpush1.msra.mxu1 %v2469_v60  ;;  %v2819_v60 = vld [vmem:[#allocation2 + $0x48] sm:$0xff] }
 0xef7   :  { %2562 = vmatprep.subr.mxu1 %v2467_v10  ;;  %v2818_v10 = vld [vmem:[#allocation2 + $0x40] sm:$0xff] }
 0xef8   :  { %2563 = vmatpush1.msra.mxu1 %v2466_v39 }
 0xef9   :  { %2564 = vmatprep.subr.mxu1 %v2464_v61 }
 0xefa   :  { %2565 = vmatpush1.msra.mxu1 %v2463_v1 }
 0xefb   :  { %2566 = vmatprep.subr.mxu1 %v2461_v2 }
 0xefc   :  { %2567 = vmatpush1.msra.mxu1 %v2460_v8 }
 0xefd   :  { %3239 = vmatmul.mubr.msk.f32.vlgmr.msra.gmra.mxu1 %vm2517_vm3, %v4740_v3  ;;  %3613 = vmatprep.subr.mxu1 %v3845_v0 }
 0xefe   :  { %2606 = vmatprep.mubr.f32.mxu1 %v3845_v0  ;;  %3614 = vmatpush3.msra.mxu1 %v2821_v51 }
 0xeff   :  { %3615 = vmatprep.subr.mxu1 %v3845_v0 }
 0xf00   :  { %3616 = vmatpush3.msra.mxu1 %v2820_v28 }
 0xf01   :  { %3240 = vmatmul.mubr.msk.f32.gmra.mxu1 %vm2517_vm3, %v4749_v20  ;;  %3617 = vmatprep.subr.mxu1 %v3845_v0 }
 0xf02   :  { %2612 = vmatprep.mubr.f32.mxu1 %v3845_v0  ;;  %3618 = vmatpush3.msra.mxu1 %v2819_v60 }
 0xf03   :  { %2797 = vrot.lane.b32.xlu1 %v2796_v12, %s3849_s27  ;;  %3619 = vmatprep.subr.mxu1 %v3845_v0 }
 0xf04   :  { %3620 = vmatpush3.msra.mxu1 %v2818_v10 }
 0xf05   :  { %3241 = vmatmul.mubr.msk.f32.gmra.mxu1 %vm2517_vm3, %v4757_v24  ;;  %3621 = vmatprep.subr.mxu1 %v3845_v0 }
 0xf06   :  { %3629 = vmatprep.mubr.msk.f32.mxu1 %vm3846_vm0, %v3845_v0 }
 0xf73   :  { %v2374_v16 = vpop.xlane.xlu1 %2373  ;;  %v2371_v58 = vpop.xlane.xlu0 %2370 }
 0xf74   :  { %3780 = vrcp.f32 %v2374_v16 }
 0xf75   :  { %3782 = vrcp.f32 %v2371_v58 }
 0xf77   :  { %v2368_v5 = vpop.xlane.xlu1 %2367  ;;  %v2365_v55 = vpop.xlane.xlu0 %2364 }
 0xf78   :  { %3784 = vrcp.f32 %v2368_v5 }
 0xf79   :  { %3786 = vrcp.f32 %v2365_v55 }
 0xf7b   :  { %v2362_v37 = vpop.xlane.xlu1 %2361 }
 0xf7c   :  { %3788 = vrcp.f32 %v2362_v37 }
 0xf81   :  { %v3781_v25 = vpop.eup %3780 }
 0xf82   :  { %v3783_v19 = vpop.eup %3782  ;;  %v2384_v41 = vmul.f32 %v3781_v25, %v4661_v59  ;;  %v2477_v59 = vld [vmem:[%s4898_s5 + $0xb0] sm:$0xff] }
 0xf83   :  { %v2383_v57 = vmul.f32 %v3783_v19, %v4651_v63 }
 0xf84   :  { %v2389_v4 = vmul.f32 %v2384_v41, %v4386_v35 }
 0xf85   :  { %v3785_v22 = vpop.eup %3784  ;;  %v2388_v30 = vmul.f32 %v2383_v57, %v4383_v17  ;;  %v3252_v57 = vld [vmem:[#allocation2 + $0xce] ss:$0 sm:$0xff] }
 0xf86   :  { %v3787_v29 = vpop.eup %3786  ;;  %3566 = vmatpush3.msra.mxu0 %v2389_v4  ;;  %v2382_v34 = vmul.f32 %v3785_v22, %v4655_v52  ;;  %v2480_v52 = vld [vmem:[%s4898_s5 + $0xd0] sm:$0xff] }
 0xf87   :  { %3567 = vmatprep.subr.mxu0 %v3845_v0  ;;  %v2381_v33 = vmul.f32 %v3787_v29, %v4643_v48  ;;  %v2498_v48 = vld [vmem:[%s4898_s5 + $0x190] sm:$0xf]  ;;  %v2513_v29 = vrot.slane %v3236_v31, %v4204_v18 }
 0xf88   :  { %3568 = vmatpush3.msra.mxu0 %v2388_v30  ;;  %v2387_v38 = vmul.f32 %v2382_v34, %v4380_v32  ;;  %v2489_v32 = vld [vmem:[%s4898_s5 + $0x130] sm:$0xff] }
 0xf89   :  { %v3789_v42 = vpop.eup %3788  ;;  %3569 = vmatprep.subr.mxu0 %v3845_v0  ;;  %v2386_v35 = vmul.f32 %v2381_v33, %v4376_v23  ;;  %v2495_v23 = vld [vmem:[%s4898_s5 + $0x170] sm:$0xff] }
 0xf8a   :  { %3570 = vmatpush3.msra.mxu0 %v2387_v38  ;;  %v2380_v63 = vmul.f32 %v3789_v42, %v4645_v62  ;;  %v2483_v62 = vld [vmem:[%s4898_s5 + $0xf0] sm:$0xff] }
 0xf8b   :  { %3571 = vmatprep.subr.mxu0 %v3845_v0 }
 0xf8c   :  { %3572 = vmatpush3.msra.mxu0 %v2386_v35  ;;  %v2385_v17 = vmul.f32 %v2380_v63, %v4372_v44  ;;  %v2492_v44 = vld [vmem:[%s4898_s5 + $0x150] sm:$0xff] }
 0xf8d   :  { %3573 = vmatprep.subr.mxu0 %v3845_v0 }
 0xf8e   :  { %3574 = vmatpush3.msra.mxu0 %v2385_v17 }
 0xf8f   :  { %3576 = vmatmul.mubr.msk.f32.vlgmr.msra.gmra.mxu0 %vm410_vm4, %v4528_v7  ;;  %3578 = vmatprep.subr.mxu0 %v3845_v0  ;;  %v2486_v7 = vld [vmem:[%s4898_s5 + $0x110] sm:$0xff]  ;;  %s3850_s5 = smov 40  }
 0xf90   :  { %3579 = vmatpush3.msk.msra.mxu0 %vm1548_vm8, %v2498_v48  ;;  %3604 = vmatprep.mubr.msk.f32.mxu0 %vm3846_vm0, %v3845_v0  ;;  %vm2827_vm8 = vcmask 523264  }
 0xf91   :  { %3580 = vmatprep.subr.mxu0 %v3845_v0 }
 0xf92   :  { %3581 = vmatpush3.msra.mxu0 %v2495_v23 }
 0xf93   :  { %3582 = vmatprep.subr.mxu0 %v3845_v0 }
 0xf94   :  { %3583 = vmatpush3.msra.mxu0 %v2492_v44 }
 0xf95   :  { %3584 = vmatprep.subr.mxu0 %v3845_v0 }
 0xf96   :  { %3585 = vmatpush3.msra.mxu0 %v2489_v32 }
 0xf97   :  { %3586 = vmatprep.subr.mxu0 %v3845_v0 }
 0xf98   :  { %3587 = vmatpush3.msra.mxu0 %v2486_v7 }
 0xf99   :  { %3588 = vmatprep.subr.mxu0 %v3845_v0 }
 0xf9a   :  { %3589 = vmatpush3.msra.mxu0 %v2483_v62 }
 0xf9b   :  { %3590 = vmatprep.subr.mxu0 %v3845_v0 }
 0xf9c   :  { %3591 = vmatpush3.msra.mxu0 %v2480_v52 }
 0xf9d   :  { %3592 = vmatprep.subr.mxu0 %v3845_v0 }
 0xf9e   :  { %3593 = vmatpush3.msra.mxu0 %v2477_v59 }
 0xf9f   :  { %3594 = vmatprep.subr.mxu0 %v3845_v0 }
 0xfa0   :  { %3595 = vmatpush3.msra.mxu0 %v2474_v43 }
 0xfa1   :  { %3596 = vmatprep.subr.mxu0 %v3845_v0 }
 0xfa2   :  { %3597 = vmatpush3.msra.mxu0 %v2471_v45 }
 0xfa3   :  { %3598 = vmatprep.subr.mxu0 %v3845_v0 }
 0xfa4   :  { %3599 = vmatpush3.msra.mxu0 %v2468_v21 }
 0xfa5   :  { %3600 = vmatprep.subr.mxu0 %v3845_v0 }
 0xfa6   :  { %3601 = vmatpush3.msra.mxu0 %v2465_v11 }
 0xfa7   :  { %3602 = vmatprep.subr.mxu0 %v3845_v0 }
 0xfa8   :  { %3603 = vmatpush3.msra.mxu0 %v2462_v46 }
 0xfa9   :  { %3605 = vmatmul.mubr.msk.f32.vlgmr.msra.gmra.mxu0 %vm2517_vm3, %v4740_v3  ;;  %3632 = vmatprep.subr.mxu0 %v3845_v0 }
 0xfaa   :  { %3607 = vmatprep.mubr.msk.f32.mxu0 %vm3846_vm0, %v3845_v0 }
 0xfad   :  { %3608 = vmatmul.mubr.msk.f32.gmra.mxu0 %vm2517_vm3, %v4749_v20 }
 0xfae   :  { %3610 = vmatprep.mubr.msk.f32.mxu0 %vm3846_vm0, %v3845_v0 }
 0xfb1   :  { %3611 = vmatmul.mubr.msk.f32.gmra.mxu0 %vm2517_vm3, %v4757_v24 }
 0xfb2   :  { %3634 = vmatprep.mubr.msk.f32.mxu0 %vm3846_vm0, %v3845_v0 }
 0xfbd   :  { %v2602_v6 = vpop.f32.mrf.mxu1 }
 0xfbe   :  { %v2603_v40 = vadd.f32 %v2602_v6, %v2505_v15 }
 0xfbf   :  { %v2604_v53 = vpop.f32.mrf.mxu1 }
 0xfc0   :  { %v3246_v50 = vmul.f32 -1.442695, %v2603_v40  ;;  %v2605_v39 = vadd.f32 %v2604_v53, %v2509_v49 }
 0xfc1   :  { %v2608_v14 = vpop.f32.mrf.mxu1 }
 0xfc2   :  { %v2609_v56 = vadd.f32 %v2608_v14, %v2505_v15  ;;  %3790 = vpow2.f32 %v3246_v50  ;;  %v3249_v3 = vmul.f32 -1.442695, %v2605_v39 }
 0xfc3   :  { %v2610_v13 = vpop.f32.mrf.mxu1 }
 0xfc4   :  { %v3247_v36 = vmul.f32 -1.442695, %v2609_v56  ;;  %v2611_v2 = vadd.f32 %v2610_v13, %v2509_v49 }
 0xfc5   :  { %v2614_v9 = vpop.f32.mrf.mxu1 }
 0xfc6   :  { %v2615_v47 = vadd.f32 %v2614_v9, %v2505_v15  ;;  %3792 = vpow2.f32 %v3247_v36  ;;  %v3250_v16 = vmul.f32 -1.442695, %v2611_v2 }
 0xfc7   :  { %v2616_v26 = vpop.f32.mrf.mxu1 }
 0xfc8   :  { %v3248_v54 = vmul.f32 -1.442695, %v2615_v47  ;;  %v2617_v58 = vadd.f32 %v2616_v26, %v2509_v49 }
 0xfca   :  { %3794 = vpow2.f32 %v3248_v54  ;;  %v3251_v37 = vmul.f32 -1.442695, %v2617_v58 }
 0xfcb   :  { %3796 = vpow2.f32 %v3249_v3 }
 0xfcf   :  { %v3791_v12 = vpop.eup %3790 }
 0xfd0   :  { %v2708_v20 = vadd.f32 1.0, %v3791_v12  ;;  %v2816_v12 = vld [vmem:[#allocation2 + $0x30] sm:$0xff] }
 0xfd2   :  { %3798 = vrcp.f32 %v2708_v20  ;;  %v2815_v20 = vld [vmem:[#allocation2 + $0x28] sm:$0xff] }
 0xfd3   :  { %v3793_v24 = vpop.eup %3792  ;;  %3800 = vpow2.f32 %v3250_v16 }
 0xfd4   :  { %v2709_v5 = vadd.f32 1.0, %v3793_v24 }
 0xfd6   :  { %3802 = vrcp.f32 %v2709_v5 }
 0xfd7   :  { %v3795_v55 = vpop.eup %3794  ;;  %3804 = vpow2.f32 %v3251_v37 }
 0xfd8   :  { %v2710_v25 = vadd.f32 1.0, %v3795_v55  ;;  %v3797_v19 = vpop.eup %3796  ;;  %v2814_v55 = vld [vmem:[#allocation2 + $0x20] sm:$0xff] }
 0xfd9   :  { %v2726_v22 = vadd.f32 1.0, %v3797_v19 }
 0xfda   :  { %3806 = vrcp.f32 %v2710_v25  ;;  %v2902_v25 = vld [vmem:[#allocation2 + $0x60] sm:$0xff] }
 0xfdb   :  { %3808 = vrcp.f32 %v2726_v22  ;;  %3633 = vmatpush3.msra.mxu0 %v2902_v25 }
 0xfdc   :  { %3656 = vmatprep.subr.mxu0 %v3845_v0 }
 0xfdf   :  { %v3799_v41 = vpop.eup %3798 }
 0xfe0   :  { %v3801_v4 = vpop.eup %3800  ;;  %v2740_v30 = vmul.f32 %v3799_v41, %v3252_v57 }
 0xfe1   :  { %v2727_v33 = vadd.f32 1.0, %v3801_v4 }
 0xfe3   :  { %v3803_v34 = vpop.eup %3802  ;;  %3810 = vrcp.f32 %v2727_v33 }
 0xfe4   :  { %v3805_v42 = vpop.eup %3804  ;;  %v2741_v48 = vmul.f32 %v3803_v34, %v3252_v57  ;;  %v2798_v34 = vpop.permute.xlu1 %2797 }
 0xfe5   :  { %v2728_v44 = vadd.f32 1.0, %v3805_v42 }
 0xfe7   :  { %v3807_v23 = vpop.eup %3806 }
 0xfe8   :  { %v2742_v59 = vmul.f32 %v3807_v23, %v3252_v57  ;;  %v3809_v11 = vpop.eup %3808 }
 0xfe9   :  { %v2749_v6 = vsub.f32 1.0, %v3809_v11  ;;  %v2984_v11 = vld [vmem:[#allocation2 + $0x78] sm:$0xff] }
 0xff0   :  { %v3811_v46 = vpop.eup %3810 }
 0xff1   :  { %v2750_v14 = vsub.f32 1.0, %v3811_v46  ;;  %v2983_v46 = vld [vmem:[#allocation2 + $0x70] sm:$0xff] }
0x104f   :  { %v2456_v61 = vpop.f32.mrf.mxu0 }
0x1050   :  { %v2800_v1 = vrot.slane %v2456_v61, 2  ;;  %2789 = vrot.lane.b32.xlu0 %v2456_v61, %s3844_s28  ;;  %s3851_s28 = smov 16  }
0x1051   :  { %v3577_v8 = vpop.f32.mrf.mxu0 }
0x1054   :  { %2801 = vrot.lane.b32.xlu0 %v2800_v1, %s3850_s5  ;;  %v2817_v1 = vld [vmem:[#allocation2 + $0x38] sm:$0xff] }
0x1055   :  { %3622 = vmatpush3.msra.mxu1 %v2817_v1 }
0x1056   :  { %3623 = vmatprep.subr.mxu1 %v3845_v0 }
0x1057   :  { %3624 = vmatpush3.msra.mxu1 %v2816_v12 }
0x1058   :  { %3625 = vmatprep.subr.mxu1 %v3845_v0 }
0x1059   :  { %3626 = vmatpush3.msra.mxu1 %v2815_v20 }
0x105a   :  { %3627 = vmatprep.subr.mxu1 %v3845_v0 }
0x105b   :  { %3628 = vmatpush3.msra.mxu1 %v2814_v55 }
0x105c   :  { %3637 = vmatprep.subr.mxu1 %v3845_v0 }
0x1069   :  { %v2685_v38 = vpop.f32.mrf.mxu0 }
0x106a   :  { %v2686_v35 = vadd.f32 %v2685_v38, %v2513_v29 }
0x106b   :  { %v3606_v63 = vpop.f32.mrf.mxu0 }
0x106c   :  { %v2743_v17 = vadd.f32 %v2740_v30, %v2686_v35 }
0x106d   :  { %v2690_v32 = vpop.f32.mrf.mxu0 }
0x106e   :  { %3812 = vtanh.f32 %v2743_v17  ;;  %v2691_v7 = vadd.f32 %v2690_v32, %v2513_v29  ;;  %v2989_v32 = vld [vmem:[#allocation2 + $0xa0] sm:$0xff] }
0x106f   :  { %v3609_v62 = vpop.f32.mrf.mxu0  ;;  %3814 = vrcp.f32 %v2728_v44 }
0x1070   :  { %v2744_v52 = vadd.f32 %v2741_v48, %v2691_v7  ;;  %v2988_v7 = vld [vmem:[#allocation2 + $0x98] sm:$0xff]  ;;  %v2986_v62 = vld [vmem:[#allocation2 + $0x88] sm:$0xff] }
0x1071   :  { %v2695_v18 = vpop.f32.mrf.mxu0 }
0x1072   :  { %3816 = vtanh.f32 %v2744_v52  ;;  %v2696_v43 = vadd.f32 %v2695_v18, %v2513_v29  ;;  %v2985_v52 = vld [vmem:[#allocation2 + $0x80] sm:$0xff] }
0x1073   :  { %v3612_v45 = vpop.f32.mrf.mxu0 }
0x1074   :  { %v2745_v21 = vadd.f32 %v2742_v59, %v2696_v43  ;;  %v3253_v59 = vld [vmem:[#allocation2 + $0xca] ss:$0 sm:$0xff] }
0x1076   :  { %3818 = vtanh.f32 %v2745_v21 }
0x107b   :  { %v3813_v31 = vpop.eup %3812 }
0x107c   :  { %v2752_v53 = vmul.f32 %v3813_v31, %v2749_v6  ;;  %v3815_v15 = vpop.eup %3814  ;;  %v2982_v6 = vld [vmem:[#allocation2 + $0x68] sm:$0xff]  ;;  %v3072_v31 = vld [vmem:[#allocation2 + $0xc0] sm:$0xff] }
0x107d   :  { %v2751_v56 = vsub.f32 1.0, %v3815_v15 }
0x107e   :  { %v2755_v50 = vmax.f32 %v2752_v53, 0.0  ;;  %v3255_v53 = vld [vmem:[#allocation2 + $0xcb] ss:$0 sm:$0xff] }
0x107f   :  { %v3817_v40 = vpop.eup %3816 }
0x1080   :  { %v2753_v13 = vmul.f32 %v3817_v40, %v2750_v14  ;;  %v2758_v47 = vsel %vm71_vm1, %v2755_v50, 0.0  ;;  %v3071_v50 = vld [vmem:[#allocation2 + $0xb8] sm:$0xff] }
0x1082   :  { %v2756_v9 = vmax.f32 %v2753_v13, 0.0 }
0x1083   :  { %v3819_v36 = vpop.eup %3818 }
0x1084   :  { %v2760_v51 = vsel %vm2759_vm5, %v2756_v9, 0.0  ;;  %v2754_v28 = vmul.f32 %v3819_v36, %v2751_v56  ;;  %v2773_v10 = vrot.slane %v2756_v9, 2  ;;  %v3070_v56 = vld [vmem:[#allocation2 + $0xb0] sm:$0xff]  ;;  %v3069_v9 = vld [vmem:[#allocation2 + $0xa8] sm:$0xff] }
0x1085   :  { %v2761_v54 = vadd.f32 %v2760_v51, %v2758_v47  ;;  %v3257_v36 = vld [vmem:[#allocation2 + $0xcc] ss:$0 sm:$0xff] }
0x1086   :  { %v2757_v60 = vmax.f32 %v2754_v28, 0.0 }
0x1087   :  { %v2762_v49 = vrot.slane %v2761_v54, 4 }
0x1088   :  { %v2774_v39 = vrot.slane %v2757_v60, 2  ;;  %v3259_v60 = vld [vmem:[#allocation2 + $0xcd] ss:$0 sm:$0xff] }
0x1089   :  { %v2763_v61 = vadd.f32 %v2762_v49, %v2761_v54 }
0x108a   :  { %v2775_v2 = vsel %vm2772_vm6, %v2773_v10, %v2774_v39  ;;  %v2779_v8 = vsel %vm2759_vm5, %v2774_v39, 0.0 }
0x108b   :  { %v2764_v3 = vrot.slane %v2763_v61, 2  ;;  %v2778_v26 = vsel %vm71_vm1, %v2775_v2, 0.0 }
0x108c   :  { %v2780_v24 = vadd.f32 %v2779_v8, %v2778_v26 }
0x108d   :  { %v2765_v16 = vadd.f32 %v2764_v3, %v2763_v61 }
0x108e   :  { %v2781_v58 = vrot.slane %v2780_v24, 4 }
0x108f   :  { %v2766_v5 = vrot.slane %v2765_v16, 1 }
0x1090   :  { %v2782_v37 = vadd.f32 %v2781_v58, %v2780_v24 }
0x1091   :  { %v2767_v19 = vadd.f32 %v2766_v5, %v2765_v16 }
0x1092   :  { %v2783_v41 = vrot.slane %v2782_v37, 2 }
0x1093   :  { %v2769_v57 = vmul.f32 0.1, %v2767_v19 }
0x1094   :  { %v2784_v4 = vadd.f32 %v2783_v41, %v2782_v37 }
0x1095   :  { %2793 = vrot.lane.b32.xlu1 %v2769_v57, %s3851_s28 }
0x1096   :  { %v2785_v22 = vrot.slane %v2784_v4, 1 }
0x1098   :  { %v2786_v29 = vadd.f32 %v2785_v22, %v2784_v4 }
0x109a   :  { %v2787_v30 = vmul.f32 0.1, %v2786_v29 }
0x109c   :  { %2805 = vrot.lane.b32.xlu1 %v2787_v30, %s3852_s4 }
0x10c2   :  { %v2790_v33 = vpop.permute.xlu0 %2789 }
0x10c3   :  { %v2808_v38 = vsel %vm870_vm14, %v4554_v27, %v2790_v33  ;;  %v2987_v27 = vld [vmem:[#allocation2 + $0x90] sm:$0xff] }
0x10c6   :  { %v2802_v17 = vpop.permute.xlu0 %2801 }
0x1107   :  { %v2794_v42 = vpop.permute.xlu1 %2793 }
0x1108   :  { %v2809_v35 = vsel %vm71_vm1, %v2808_v38, %v2794_v42 }
0x1109   :  { %v2810_v63 = vsel %vm289_vm2, %v2809_v35, %v2798_v34 }
0x110a   :  { %v2811_v48 = vsel %vm410_vm4, %v2810_v63, %v2802_v17 }
0x110e   :  { %v2806_v23 = vpop.permute.xlu1 %2805 }
0x110f   :  { %v2813_v44 = vsel %vm2812_vm7, %v2811_v48, %v2806_v23 }
0x1110   :  { %3630 = vmatmul.mubr.msk.f32.vlgmr.msra.gmra.mxu1 %vm2827_vm8, %v2813_v44 }
0x1111   :  { %3653 = vmatprep.mubr.msk.f32.mxu1 %vm3846_vm0, %v3845_v0  ;;  %3638 = vmatpush3.msra.mxu1 %v2989_v32 }
0x1112   :  { %3639 = vmatprep.subr.mxu1 %v3845_v0 }
0x1113   :  { %3640 = vmatpush3.msra.mxu1 %v2988_v7 }
0x1114   :  { %3641 = vmatprep.subr.mxu1 %v3845_v0 }
0x1115   :  { %3642 = vmatpush3.msra.mxu1 %v2987_v27 }
0x1116   :  { %3643 = vmatprep.subr.mxu1 %v3845_v0 }
0x1117   :  { %3644 = vmatpush3.msra.mxu1 %v2986_v62 }
0x1118   :  { %3645 = vmatprep.subr.mxu1 %v3845_v0 }
0x1119   :  { %3646 = vmatpush3.msra.mxu1 %v2985_v52 }
0x111a   :  { %3647 = vmatprep.subr.mxu1 %v3845_v0 }
0x111b   :  { %3648 = vmatpush3.msra.mxu1 %v2984_v11 }
0x111c   :  { %3649 = vmatprep.subr.mxu1 %v3845_v0 }
0x111d   :  { %3650 = vmatpush3.msra.mxu1 %v2983_v46 }
0x111e   :  { %3651 = vmatprep.subr.mxu1 %v3845_v0 }
0x111f   :  { %3652 = vmatpush3.msra.mxu1 %v2982_v6 }
0x11d0   :  { %v2897_v18 = vpop.f32.mrf.mxu1 }
0x11d1   :  { %v2898_v43 = vadd.f32 %v3253_v59, %v2897_v18 }
0x11d2   :  { %v3631_v45 = vpop.f32.mrf.mxu1 }
0x11d3   :  { %v2901_v21 = vmax.f32 %v2898_v43, 0.0 }
0x11d5   :  { %3635 = vmatmul.mubr.msk.f32.vlgmr.msra.gmra.mxu0 %vm870_vm14, %v2901_v21 }
0x11d6   :  { %3664 = vmatprep.mubr.msk.f32.mxu0 %vm3846_vm0, %v3845_v0  ;;  %3657 = vmatpush3.msra.mxu0 %v3072_v31  ;;  %vm3151_vm0 = vcmask 1024  }
0x11d7   :  { %3658 = vmatprep.subr.mxu0 %v3845_v0 }
0x11d8   :  { %3659 = vmatpush3.msra.mxu0 %v3071_v50 }
0x11d9   :  { %3660 = vmatprep.subr.mxu0 %v3845_v0 }
0x11da   :  { %3661 = vmatpush3.msra.mxu0 %v3070_v56 }
0x11db   :  { %3662 = vmatprep.subr.mxu0 %v3845_v0 }
0x11dc   :  { %3663 = vmatpush3.msra.mxu0 %v3069_v9 }
0x1295   :  { %v2977_v15 = vpop.f32.mrf.mxu0 }
0x1296   :  { %v2978_v14 = vadd.f32 %v3255_v53, %v2977_v15 }
0x1297   :  { %v3636_v40 = vpop.f32.mrf.mxu0 }
0x1298   :  { %v2981_v13 = vmax.f32 %v2978_v14, 0.0 }
0x129a   :  { %3654 = vmatmul.mubr.msk.f32.vlgmr.msra.gmra.mxu1 %vm2827_vm8, %v2981_v13 }
0x135a   :  { %v3064_v47 = vpop.f32.mrf.mxu1 }
0x135b   :  { %v3065_v51 = vadd.f32 %v3257_v36, %v3064_v47 }
0x135c   :  { %v3655_v28 = vpop.f32.mrf.mxu1 }
0x135d   :  { %v3068_v54 = vmax.f32 %v3065_v51, 0.0 }
0x135f   :  { %3665 = vmatmul.mubr.msk.f32.vlgmr.msra.gmra.mxu0 %vm289_vm2, %v3068_v54 }
0x141f   :  { %v3147_v49 = vpop.f32.mrf.mxu0 }
0x1420   :  { %v3148_v10 = vadd.f32 %v3259_v60, %v3147_v49 }
0x1421   :  { %v3666_v39 = vpop.f32.mrf.mxu0 }
0x1422   :  { %3152 = vst.msk [vmem:[%s4900_s7] sm:$0x3] %vm3151_vm0, %v3148_v10 }
0x1423   :  { %3157 = vsyncpa [#allocation3], 1 }

</bundles_post_ra>
